<compile_context>
chip_gen: v7x
topology: tpu7x:2x2x1
jax: 0.10.0
libtpu: 0.0.40
codegen_flags: <defaults>
</compile_context>

<pallas_src>
import functools

import jax
import jax.numpy as jnp
import numpy as np
from jax.experimental import pallas as pl
from jax.experimental.pallas import tpu as pltpu


# ---------------------------------------------------------------------------
# Kernels
# ---------------------------------------------------------------------------
def agg_fused_kernel(a_ref, x_ref, w1_ref, b1_ref, w2_ref,
                     h1_ref, z2_ref, acc_ref):
    """H1 = relu(A @ (X @ W1) + b1);  Z2 = H1 @ W2 (fused next-layer transform)."""
    k = pl.program_id(1)

    @pl.when(k == 0)
    def _():
        acc_ref[...] = jnp.zeros_like(acc_ref)

    # Recompute the (cheap) column-tile feature transform in-kernel:
    # tk*cin*h_pad flops << tm*tk*h_pad flops of the A matmul, and it removes
    # the Z1 HBM round-trip entirely.
    z1 = jnp.dot(x_ref[...], w1_ref[...],
                 preferred_element_type=jnp.float32).astype(jnp.bfloat16)
    acc_ref[...] += jnp.dot(a_ref[...], z1, preferred_element_type=jnp.float32)

    @pl.when(k == pl.num_programs(1) - 1)
    def _():
        h = jnp.maximum(acc_ref[...] + b1_ref[...], 0.0)
        h1_ref[...] = h.astype(h1_ref.dtype)
        z2_ref[...] = jnp.dot(h.astype(w2_ref.dtype), w2_ref[...],
                              preferred_element_type=jnp.float32).astype(z2_ref.dtype)


def agg_kernel(a_ref, z_ref, b_ref, h_ref, acc_ref):
    """H = relu(A @ Z + b)."""
    k = pl.program_id(1)

    @pl.when(k == 0)
    def _():
        acc_ref[...] = jnp.zeros_like(acc_ref)

    acc_ref[...] += jnp.dot(a_ref[...], z_ref[...],
                            preferred_element_type=jnp.float32)

    @pl.when(k == pl.num_programs(1) - 1)
    def _():
        h_ref[...] = jnp.maximum(acc_ref[...] + b_ref[...], 0.0).astype(h_ref.dtype)


def pool_kernel(p_ref, h1_ref, h2_ref, s1_ref, s2_ref, acc1_ref, acc2_ref):
    """S1 = P @ H1, S2 = P @ H2  (global_add_pool of both layers)."""
    k = pl.program_id(0)

    @pl.when(k == 0)
    def _():
        acc1_ref[...] = jnp.zeros_like(acc1_ref)
        acc2_ref[...] = jnp.zeros_like(acc2_ref)

    p = p_ref[...]
    acc1_ref[...] += jnp.dot(p, h1_ref[...], preferred_element_type=jnp.float32)
    acc2_ref[...] += jnp.dot(p, h2_ref[...], preferred_element_type=jnp.float32)

    @pl.when(k == pl.num_programs(0) - 1)
    def _():
        s1_ref[...] = acc1_ref[...]
        s2_ref[...] = acc2_ref[...]


# ---------------------------------------------------------------------------
# Wrapper
# ---------------------------------------------------------------------------
def _round_up(x, m):
    return ((x + m - 1) // m) * m


def _pick_tile(n_pad, target, granule=256):
    """Largest multiple of `granule` that divides n_pad and is <= max(target, granule)."""
    target = max(target, granule)
    best = granule
    for t in range(granule, min(target, n_pad) + 1, granule):
        if n_pad % t == 0:
            best = t
    return best


def prepare_gcn_inputs(a_hat, pool_mat, w1, b1, w2, b2, *, granule=256):
    """Pad/cast the call-invariant operands ONCE, outside the jit'd forward.

    Returns lane-dense, tile-aligned bf16/f32 arrays ready for gcn_forward.
    """
    n = a_hat.shape[0]
    cin, hidden = w1.shape
    out_ch = w2.shape[1]
    g = pool_mat.shape[0]
    lane = 128

    n_pad = _round_up(n, granule)
    h_pad = _round_up(hidden, lane)
    o_pad = _round_up(out_ch, lane)

    f32, bf16 = jnp.float32, jnp.bfloat16
    a_p = jnp.zeros((n_pad, n_pad), bf16).at[:n, :n].set(a_hat.astype(bf16))
    p_p = jnp.zeros((g, n_pad), bf16).at[:, :n].set(pool_mat.astype(bf16))
    w1_p = jnp.zeros((cin, h_pad), bf16).at[:, :hidden].set(w1.astype(bf16))
    w2_p = jnp.zeros((h_pad, o_pad), bf16).at[:hidden, :out_ch].set(w2.astype(bf16))
    b1_p = jnp.zeros((1, h_pad), f32).at[:, :hidden].set(b1.reshape(1, hidden).astype(f32))
    b2_p = jnp.zeros((1, o_pad), f32).at[:, :out_ch].set(b2.reshape(1, out_ch).astype(f32))
    return a_p, p_p, w1_p, b1_p, w2_p, b2_p


@functools.partial(jax.jit, static_argnames=("n", "hidden", "out_ch"))
def gcn_forward(x, a_p, p_p, w1_p, b1_p, w2_p, b2_p, *, n, hidden, out_ch):
    """Forward pass matching the PyTorch GCN module.

    Returns (h2 [N, out_ch], s_cat [G, hidden + out_ch]), i.e.
    (x, torch.cat([s_x1, s_x2], dim=1)).
    """
    n_pad = a_p.shape[0]
    cin = x.shape[1]
    h_pad = w1_p.shape[1]
    o_pad = w2_p.shape[1]
    g = p_p.shape[0]
    f32, bf16 = jnp.float32, jnp.bfloat16

    # Tile sizes: divisors of n_pad.  tm is capped at n_pad // 2 so the
    # "parallel" row axis splits across both v7x TensorCores when possible;
    # large tk gives long DMA runs and few reduction steps.
    tm = _pick_tile(n_pad, min(1024, n_pad // 2))
    tk = _pick_tile(n_pad, 2048)
    n_rows = n_pad // tm
    n_cols = n_pad // tk

    mosaic = functools.partial(pltpu.CompilerParams,
                               vmem_limit_bytes=32 * 1024 * 1024)

    # Per-call node features: tiny O(N * cin) pad/cast stays in-jit.
    x_p = jnp.zeros((n_pad, cin), bf16).at[:n, :].set(x.astype(bf16))

    # --- Layer 1 (fused): H1 = relu(A @ (X @ W1) + b1);  Z2 = H1 @ W2 --------
    h1, z2 = pl.pallas_call(
        agg_fused_kernel,
        out_shape=(jax.ShapeDtypeStruct((n_pad, h_pad), bf16),
                   jax.ShapeDtypeStruct((n_pad, o_pad), bf16)),
        grid=(n_rows, n_cols),
        in_specs=[pl.BlockSpec((tm, tk), lambda i, k: (i, k)),
                  pl.BlockSpec((tk, cin), lambda i, k: (k, 0)),
                  pl.BlockSpec((cin, h_pad), lambda i, k: (0, 0)),
                  pl.BlockSpec((1, h_pad), lambda i, k: (0, 0)),
                  pl.BlockSpec((h_pad, o_pad), lambda i, k: (0, 0))],
        out_specs=(pl.BlockSpec((tm, h_pad), lambda i, k: (i, 0)),
                   pl.BlockSpec((tm, o_pad), lambda i, k: (i, 0))),
        scratch_shapes=[pltpu.VMEM((tm, h_pad), f32)],
        compiler_params=mosaic(dimension_semantics=("parallel", "arbitrary")),
    )(a_p, x_p, w1_p, b1_p, w2_p)

    # --- Layer 2 aggregation: H2 = relu(A @ Z2 + b2), stored bf16 -------------
    h2 = pl.pallas_call(
        agg_kernel,
        out_shape=jax.ShapeDtypeStruct((n_pad, o_pad), bf16),
        grid=(n_rows, n_cols),
        in_specs=[pl.BlockSpec((tm, tk), lambda i, k: (i, k)),
                  pl.BlockSpec((tk, o_pad), lambda i, k: (k, 0)),
                  pl.BlockSpec((1, o_pad), lambda i, k: (0, 0))],
        out_specs=pl.BlockSpec((tm, o_pad), lambda i, k: (i, 0)),
        scratch_shapes=[pltpu.VMEM((tm, o_pad), f32)],
        compiler_params=mosaic(dimension_semantics=("parallel", "arbitrary")),
    )(a_p, z2, b2_p)

    # --- global_add_pool of both layers ---------------------------------------
    s1, s2 = pl.pallas_call(
        pool_kernel,
        out_shape=(jax.ShapeDtypeStruct((g, h_pad), f32),
                   jax.ShapeDtypeStruct((g, o_pad), f32)),
        grid=(n_cols,),
        in_specs=[pl.BlockSpec((g, tk), lambda k: (0, k)),
                  pl.BlockSpec((tk, h_pad), lambda k: (k, 0)),
                  pl.BlockSpec((tk, o_pad), lambda k: (k, 0))],
        out_specs=(pl.BlockSpec((g, h_pad), lambda k: (0, 0)),
                   pl.BlockSpec((g, o_pad), lambda k: (0, 0))),
        scratch_shapes=[pltpu.VMEM((g, h_pad), f32),
                        pltpu.VMEM((g, o_pad), f32)],
        compiler_params=mosaic(dimension_semantics=("arbitrary",)),
    )(p_p, h1, h2)

    # Slice lane-padded results back to logical widths (free wrapper plumbing).
    # Padded rows (>= n) of H1/H2 equal relu(bias); they never leak because
    # A's and P's padded columns are zero and we slice to :n here.
    h2_out = h2[:n, :out_ch].astype(f32)
    s_cat = jnp.concatenate([s1[:, :hidden], s2[:, :out_ch]], axis=1)
    return h2_out, s_cat


def gcn_norm_dense(edge_index, num_nodes):
    """Dense A_hat = D^-1/2 (A + I) D^-1/2 matching PyG GCNConv defaults."""
    src, tgt = edge_index
    loop = jnp.arange(num_nodes)
    src = jnp.concatenate([src, loop])
    tgt = jnp.concatenate([tgt, loop])
    a = jnp.zeros((num_nodes, num_nodes), jnp.float32).at[tgt, src].add(1.0)
    deg = a.sum(axis=1)
    dinv = jnp.where(deg > 0, 1.0 / jnp.sqrt(deg), 0.0)
    return dinv[:, None] * a * dinv[None, :]


def glorot(key, shape):
    fan_in, fan_out = shape
    limit = jnp.sqrt(6.0 / (fan_in + fan_out))
    return jax.random.uniform(key, shape, jnp.float32, -limit, limit)


if __name__ == "__main__":
    # Small synthetic graph batch: 2 graphs of 8 nodes each (ring topology).
    N_PER_GRAPH, NUM_GRAPHS = 8, 2
    N = N_PER_GRAPH * NUM_GRAPHS
    IN_CH, HIDDEN, OUT_CH = 8, 32, 16

    src_list, tgt_list = [], []
    for gi in range(NUM_GRAPHS):
        off = gi * N_PER_GRAPH
        for i in range(N_PER_GRAPH):
            a_node, b_node = off + i, off + (i + 1) % N_PER_GRAPH
            src_list += [a_node, b_node]
            tgt_list += [b_node, a_node]
    edge_index = jnp.array([src_list, tgt_list], dtype=jnp.int32)
    batch = jnp.repeat(jnp.arange(NUM_GRAPHS), N_PER_GRAPH)

    key = jax.random.PRNGKey(0)
    kx, kw1, kw2 = jax.random.split(key, 3)
    x = jax.random.normal(kx, (N, IN_CH), jnp.float32)
    w1 = glorot(kw1, (IN_CH, HIDDEN))
    b1 = jnp.zeros((1, HIDDEN), jnp.float32)
    w2 = glorot(kw2, (HIDDEN, OUT_CH))
    b2 = jnp.zeros((1, OUT_CH), jnp.float32)

    a_hat = gcn_norm_dense(edge_index, N)
    pool_mat = (batch[None, :] == jnp.arange(NUM_GRAPHS)[:, None]).astype(jnp.float32)

    # Call-invariant prep (pad + bf16 cast) is hoisted out of the jit'd forward.
    prep = prepare_gcn_inputs(a_hat, pool_mat, w1, b1, w2, b2)
    prep = jax.block_until_ready(prep)

    h2, s_cat = gcn_forward(x, *prep, n=N, hidden=HIDDEN, out_ch=OUT_CH)
    jax.block_until_ready((h2, s_cat))

    # Pure-JAX f32 reference (kernel uses bf16 MXU inputs -> loose tolerance).
    h1_ref = jnp.maximum(a_hat @ (x @ w1) + b1, 0.0)
    s1_ref = pool_mat @ h1_ref
    h2_ref = jnp.maximum(a_hat @ (h1_ref @ w2) + b2, 0.0)
    s2_ref = pool_mat @ h2_ref
    s_ref = jnp.concatenate([s1_ref, s2_ref], axis=1)

    np.testing.assert_allclose(np.asarray(h2), np.asarray(h2_ref), rtol=5e-2, atol=5e-2)
    np.testing.assert_allclose(np.asarray(s_cat), np.asarray(s_ref), rtol=5e-2, atol=5e-2)
    print("KERNEL_OK")
</pallas_src>

<mosaic_0001>
module attributes {stable_mosaic.version = 11 : i64} {
  func.func @agg_fused_kernel(%arg0: i32, %arg1: i32, %arg2: memref<256x256xbf16, #tpu.memory_space<vmem>>, %arg3: memref<256x8xbf16, #tpu.memory_space<vmem>>, %arg4: memref<8x128xbf16, #tpu.memory_space<vmem>>, %arg5: memref<1x128xf32, #tpu.memory_space<vmem>>, %arg6: memref<128x128xbf16, #tpu.memory_space<vmem>>, %arg7: memref<256x128xbf16, #tpu.memory_space<vmem>>, %arg8: memref<256x128xbf16, #tpu.memory_space<vmem>>, %arg9: memref<256x128xf32, #tpu.memory_space<vmem>>) attributes {dimension_semantics = [#tpu.dimension_semantics<parallel>, #tpu.dimension_semantics<arbitrary>], iteration_bounds = array<i64: 1, 1>, scalar_prefetch = 0 : i64, scratch_operands = 1 : i64, tpu.core_type = #tpu.core_type<tc>, window_params = [{transform_indices = @transform_0, window_bounds = array<i64: 256, 256>}, {transform_indices = @transform_1, window_bounds = array<i64: 256, 8>}, {pipeline_mode = #tpu.pipeline_mode<synchronous>, transform_indices = @transform_2, window_bounds = array<i64: 8, 128>}, {pipeline_mode = #tpu.pipeline_mode<synchronous>, transform_indices = @transform_3, window_bounds = array<i64: 1, 128>}, {pipeline_mode = #tpu.pipeline_mode<synchronous>, transform_indices = @transform_4, window_bounds = array<i64: 128, 128>}, {transform_indices = @transform_5, window_bounds = array<i64: 256, 128>}, {transform_indices = @transform_6, window_bounds = array<i64: 256, 128>}]} {
    %c0_i32 = arith.constant 0 : i32
    %0 = arith.cmpi eq, %arg1, %c0_i32 : i32
    %1 = arith.extui %0 : i1 to i32
    %c0_i32_0 = arith.constant 0 : i32
    %2 = arith.cmpi ne, %1, %c0_i32_0 : i32
    scf.if %2 {
      %cst_13 = arith.constant 0.000000e+00 : f32
      %15 = vector.broadcast %cst_13 : f32 to vector<256x128xf32>
      %c0_14 = arith.constant 0 : index
      %c0_15 = arith.constant 0 : index
      %16 = vector.load %arg9[%c0_14, %c0_15] : memref<256x128xf32, #tpu.memory_space<vmem>>, vector<256x128xf32>
      tpu.vector_store %arg9[%c0_14, %c0_15], %15 {strides = array<i32>} : memref<256x128xf32, #tpu.memory_space<vmem>>, vector<256x128xf32>,
    } else {
    }
    %c0 = arith.constant 0 : index
    %c0_1 = arith.constant 0 : index
    %3 = vector.load %arg3[%c0, %c0_1] : memref<256x8xbf16, #tpu.memory_space<vmem>>, vector<256x8xbf16>
    %c0_2 = arith.constant 0 : index
    %c0_3 = arith.constant 0 : index
    %4 = vector.load %arg4[%c0_2, %c0_3] : memref<8x128xbf16, #tpu.memory_space<vmem>>, vector<8x128xbf16>
    %cst = arith.constant dense<0.000000e+00> : vector<256x128xf32>
    %5 = tpu.matmul %3, %4, %cst {dimension_numbers = #tpu.dot_dimension_numbers<[1], [0], [0], [1], [0, 0, 1, 1], [], []>} : vector<256x8xbf16>, vector<8x128xbf16>, vector<256x128xf32> -> vector<256x128xf32>
    %6 = arith.truncf %5 : vector<256x128xf32> to vector<256x128xbf16>
    %c0_4 = arith.constant 0 : index
    %c0_5 = arith.constant 0 : index
    %7 = vector.load %arg9[%c0_4, %c0_5] : memref<256x128xf32, #tpu.memory_space<vmem>>, vector<256x128xf32>
    %c0_6 = arith.constant 0 : index
    %c0_7 = arith.constant 0 : index
    %8 = vector.load %arg2[%c0_6, %c0_7] : memref<256x256xbf16, #tpu.memory_space<vmem>>, vector<256x256xbf16>
    %cst_8 = arith.constant dense<0.000000e+00> : vector<256x128xf32>
    %9 = tpu.matmul %8, %6, %cst_8 {dimension_numbers = #tpu.dot_dimension_numbers<[1], [0], [0], [1], [0, 0, 1, 1], [], []>} : vector<256x256xbf16>, vector<256x128xbf16>, vector<256x128xf32> -> vector<256x128xf32>
    %10 = arith.addf %7, %9 : vector<256x128xf32>
    %c0_9 = arith.constant 0 : index
    %c0_10 = arith.constant 0 : index
    %11 = vector.load %arg9[%c0_9, %c0_10] : memref<256x128xf32, #tpu.memory_space<vmem>>, vector<256x128xf32>
    tpu.vector_store %arg9[%c0_9, %c0_10], %10 {strides = array<i32>} : memref<256x128xf32, #tpu.memory_space<vmem>>, vector<256x128xf32>,
    %c0_i32_11 = arith.constant 0 : i32
    %12 = arith.cmpi eq, %arg1, %c0_i32_11 : i32
    %13 = arith.extui %12 : i1 to i32
    %c0_i32_12 = arith.constant 0 : i32
    %14 = arith.cmpi ne, %13, %c0_i32_12 : i32
    scf.if %14 {
      %c0_13 = arith.constant 0 : index
      %c0_14 = arith.constant 0 : index
      %15 = vector.load %arg9[%c0_13, %c0_14] : memref<256x128xf32, #tpu.memory_space<vmem>>, vector<256x128xf32>
      %c0_15 = arith.constant 0 : index
      %c0_16 = arith.constant 0 : index
      %16 = vector.load %arg5[%c0_15, %c0_16] : memref<1x128xf32, #tpu.memory_space<vmem>>, vector<1x128xf32>
      %17 = vector.broadcast %16 : vector<1x128xf32> to vector<256x128xf32>
      %18 = arith.addf %15, %17 : vector<256x128xf32>
      %cst_17 = arith.constant 0.000000e+00 : f32
      %19 = vector.broadcast %cst_17 : f32 to vector<256x128xf32>
      %20 = arith.maximumf %18, %19 : vector<256x128xf32>
      %21 = arith.truncf %20 : vector<256x128xf32> to vector<256x128xbf16>
      %c0_18 = arith.constant 0 : index
      %c0_19 = arith.constant 0 : index
      %22 = vector.load %arg7[%c0_18, %c0_19] : memref<256x128xbf16, #tpu.memory_space<vmem>>, vector<256x128xbf16>
      tpu.vector_store %arg7[%c0_18, %c0_19], %21 {strides = array<i32>} : memref<256x128xbf16, #tpu.memory_space<vmem>>, vector<256x128xbf16>,
      %23 = arith.truncf %20 : vector<256x128xf32> to vector<256x128xbf16>
      %c0_20 = arith.constant 0 : index
      %c0_21 = arith.constant 0 : index
      %24 = vector.load %arg6[%c0_20, %c0_21] : memref<128x128xbf16, #tpu.memory_space<vmem>>, vector<128x128xbf16>
      %cst_22 = arith.constant dense<0.000000e+00> : vector<256x128xf32>
      %25 = tpu.matmul %23, %24, %cst_22 {dimension_numbers = #tpu.dot_dimension_numbers<[1], [0], [0], [1], [0, 0, 1, 1], [], []>} : vector<256x128xbf16>, vector<128x128xbf16>, vector<256x128xf32> -> vector<256x128xf32>
      %26 = arith.truncf %25 : vector<256x128xf32> to vector<256x128xbf16>
      %c0_23 = arith.constant 0 : index
      %c0_24 = arith.constant 0 : index
      %27 = vector.load %arg8[%c0_23, %c0_24] : memref<256x128xbf16, #tpu.memory_space<vmem>>, vector<256x128xbf16>
      tpu.vector_store %arg8[%c0_23, %c0_24], %26 {strides = array<i32>} : memref<256x128xbf16, #tpu.memory_space<vmem>>, vector<256x128xbf16>,
    } else {
    }
    return
  }
  func.func @transform_0(%arg0: i32, %arg1: i32) -> (i32, i32) {
    %c0_i32 = arith.constant 0 : i32
    return %arg0, %arg1 : i32, i32
  }
  func.func @transform_1(%arg0: i32, %arg1: i32) -> (i32, i32) {
    %c0_i32 = arith.constant 0 : i32
    %c0_i32_0 = arith.constant 0 : i32
    return %arg1, %c0_i32 : i32, i32
  }
  func.func @transform_2(%arg0: i32, %arg1: i32) -> (i32, i32) {
    %c0_i32 = arith.constant 0 : i32
    %c0_i32_0 = arith.constant 0 : i32
    %c0_i32_1 = arith.constant 0 : i32
    return %c0_i32, %c0_i32_0 : i32, i32
  }
  func.func @transform_3(%arg0: i32, %arg1: i32) -> (i32, i32) {
    %c0_i32 = arith.constant 0 : i32
    %c0_i32_0 = arith.constant 0 : i32
    %c0_i32_1 = arith.constant 0 : i32
    return %c0_i32, %c0_i32_0 : i32, i32
  }
  func.func @transform_4(%arg0: i32, %arg1: i32) -> (i32, i32) {
    %c0_i32 = arith.constant 0 : i32
    %c0_i32_0 = arith.constant 0 : i32
    %c0_i32_1 = arith.constant 0 : i32
    return %c0_i32, %c0_i32_0 : i32, i32
  }
  func.func @transform_5(%arg0: i32, %arg1: i32) -> (i32, i32) {
    %c0_i32 = arith.constant 0 : i32
    %c0_i32_0 = arith.constant 0 : i32
    return %arg0, %c0_i32 : i32, i32
  }
  func.func @transform_6(%arg0: i32, %arg1: i32) -> (i32, i32) {
    %c0_i32 = arith.constant 0 : i32
    %c0_i32_0 = arith.constant 0 : i32
    return %arg0, %c0_i32 : i32, i32
  }
}

module attributes {stable_mosaic.version = 11 : i64} {
  func.func @agg_kernel(%arg0: i32, %arg1: i32, %arg2: memref<256x256xbf16, #tpu.memory_space<vmem>>, %arg3: memref<256x128xbf16, #tpu.memory_space<vmem>>, %arg4: memref<1x128xf32, #tpu.memory_space<vmem>>, %arg5: memref<256x128xbf16, #tpu.memory_space<vmem>>, %arg6: memref<256x128xf32, #tpu.memory_space<vmem>>) attributes {dimension_semantics = [#tpu.dimension_semantics<parallel>, #tpu.dimension_semantics<arbitrary>], iteration_bounds = array<i64: 1, 1>, scalar_prefetch = 0 : i64, scratch_operands = 1 : i64, tpu.core_type = #tpu.core_type<tc>, window_params = [{transform_indices = @transform_0, window_bounds = array<i64: 256, 256>}, {transform_indices = @transform_1, window_bounds = array<i64: 256, 128>}, {pipeline_mode = #tpu.pipeline_mode<synchronous>, transform_indices = @transform_2, window_bounds = array<i64: 1, 128>}, {transform_indices = @transform_3, window_bounds = array<i64: 256, 128>}]} {
    %c0_i32 = arith.constant 0 : i32
    %0 = arith.cmpi eq, %arg1, %c0_i32 : i32
    %1 = arith.extui %0 : i1 to i32
    %c0_i32_0 = arith.constant 0 : i32
    %2 = arith.cmpi ne, %1, %c0_i32_0 : i32
    scf.if %2 {
      %cst_10 = arith.constant 0.000000e+00 : f32
      %12 = vector.broadcast %cst_10 : f32 to vector<256x128xf32>
      %c0_11 = arith.constant 0 : index
      %c0_12 = arith.constant 0 : index
      %13 = vector.load %arg6[%c0_11, %c0_12] : memref<256x128xf32, #tpu.memory_space<vmem>>, vector<256x128xf32>
      tpu.vector_store %arg6[%c0_11, %c0_12], %12 {strides = array<i32>} : memref<256x128xf32, #tpu.memory_space<vmem>>, vector<256x128xf32>,
    } else {
    }
    %c0 = arith.constant 0 : index
    %c0_1 = arith.constant 0 : index
    %3 = vector.load %arg6[%c0, %c0_1] : memref<256x128xf32, #tpu.memory_space<vmem>>, vector<256x128xf32>
    %c0_2 = arith.constant 0 : index
    %c0_3 = arith.constant 0 : index
    %4 = vector.load %arg2[%c0_2, %c0_3] : memref<256x256xbf16, #tpu.memory_space<vmem>>, vector<256x256xbf16>
    %c0_4 = arith.constant 0 : index
    %c0_5 = arith.constant 0 : index
    %5 = vector.load %arg3[%c0_4, %c0_5] : memref<256x128xbf16, #tpu.memory_space<vmem>>, vector<256x128xbf16>
    %cst = arith.constant dense<0.000000e+00> : vector<256x128xf32>
    %6 = tpu.matmul %4, %5, %cst {dimension_numbers = #tpu.dot_dimension_numbers<[1], [0], [0], [1], [0, 0, 1, 1], [], []>} : vector<256x256xbf16>, vector<256x128xbf16>, vector<256x128xf32> -> vector<256x128xf32>
    %7 = arith.addf %3, %6 : vector<256x128xf32>
    %c0_6 = arith.constant 0 : index
    %c0_7 = arith.constant 0 : index
    %8 = vector.load %arg6[%c0_6, %c0_7] : memref<256x128xf32, #tpu.memory_space<vmem>>, vector<256x128xf32>
    tpu.vector_store %arg6[%c0_6, %c0_7], %7 {strides = array<i32>} : memref<256x128xf32, #tpu.memory_space<vmem>>, vector<256x128xf32>,
    %c0_i32_8 = arith.constant 0 : i32
    %9 = arith.cmpi eq, %arg1, %c0_i32_8 : i32
    %10 = arith.extui %9 : i1 to i32
    %c0_i32_9 = arith.constant 0 : i32
    %11 = arith.cmpi ne, %10, %c0_i32_9 : i32
    scf.if %11 {
      %c0_10 = arith.constant 0 : index
      %c0_11 = arith.constant 0 : index
      %12 = vector.load %arg6[%c0_10, %c0_11] : memref<256x128xf32, #tpu.memory_space<vmem>>, vector<256x128xf32>
      %c0_12 = arith.constant 0 : index
      %c0_13 = arith.constant 0 : index
      %13 = vector.load %arg4[%c0_12, %c0_13] : memref<1x128xf32, #tpu.memory_space<vmem>>, vector<1x128xf32>
      %14 = vector.broadcast %13 : vector<1x128xf32> to vector<256x128xf32>
      %15 = arith.addf %12, %14 : vector<256x128xf32>
      %cst_14 = arith.constant 0.000000e+00 : f32
      %16 = vector.broadcast %cst_14 : f32 to vector<256x128xf32>
      %17 = arith.maximumf %15, %16 : vector<256x128xf32>
      %18 = arith.truncf %17 : vector<256x128xf32> to vector<256x128xbf16>
      %c0_15 = arith.constant 0 : index
      %c0_16 = arith.constant 0 : index
      %19 = vector.load %arg5[%c0_15, %c0_16] : memref<256x128xbf16, #tpu.memory_space<vmem>>, vector<256x128xbf16>
      tpu.vector_store %arg5[%c0_15, %c0_16], %18 {strides = array<i32>} : memref<256x128xbf16, #tpu.memory_space<vmem>>, vector<256x128xbf16>,
    } else {
    }
    return
  }
  func.func @transform_0(%arg0: i32, %arg1: i32) -> (i32, i32) {
    %c0_i32 = arith.constant 0 : i32
    return %arg0, %arg1 : i32, i32
  }
  func.func @transform_1(%arg0: i32, %arg1: i32) -> (i32, i32) {
    %c0_i32 = arith.constant 0 : i32
    %c0_i32_0 = arith.constant 0 : i32
    return %arg1, %c0_i32 : i32, i32
  }
  func.func @transform_2(%arg0: i32, %arg1: i32) -> (i32, i32) {
    %c0_i32 = arith.constant 0 : i32
    %c0_i32_0 = arith.constant 0 : i32
    %c0_i32_1 = arith.constant 0 : i32
    return %c0_i32, %c0_i32_0 : i32, i32
  }
  func.func @transform_3(%arg0: i32, %arg1: i32) -> (i32, i32) {
    %c0_i32 = arith.constant 0 : i32
    %c0_i32_0 = arith.constant 0 : i32
    return %arg0, %c0_i32 : i32, i32
  }
}

module attributes {stable_mosaic.version = 11 : i64} {
  func.func @pool_kernel(%arg0: i32, %arg1: memref<2x256xbf16, #tpu.memory_space<vmem>>, %arg2: memref<256x128xbf16, #tpu.memory_space<vmem>>, %arg3: memref<256x128xbf16, #tpu.memory_space<vmem>>, %arg4: memref<2x128xf32, #tpu.memory_space<vmem>>, %arg5: memref<2x128xf32, #tpu.memory_space<vmem>>, %arg6: memref<2x128xf32, #tpu.memory_space<vmem>>, %arg7: memref<2x128xf32, #tpu.memory_space<vmem>>) attributes {dimension_semantics = [#tpu.dimension_semantics<arbitrary>], iteration_bounds = array<i64: 1>, scalar_prefetch = 0 : i64, scratch_operands = 2 : i64, tpu.core_type = #tpu.core_type<tc>, window_params = [{transform_indices = @transform_0, window_bounds = array<i64: 2, 256>}, {transform_indices = @transform_1, window_bounds = array<i64: 256, 128>}, {transform_indices = @transform_2, window_bounds = array<i64: 256, 128>}, {pipeline_mode = #tpu.pipeline_mode<synchronous>, transform_indices = @transform_3, window_bounds = array<i64: 2, 128>}, {pipeline_mode = #tpu.pipeline_mode<synchronous>, transform_indices = @transform_4, window_bounds = array<i64: 2, 128>}]} {
    %c0_i32 = arith.constant 0 : i32
    %0 = arith.cmpi eq, %arg0, %c0_i32 : i32
    %1 = arith.extui %0 : i1 to i32
    %c0_i32_0 = arith.constant 0 : i32
    %2 = arith.cmpi ne, %1, %c0_i32_0 : i32
    scf.if %2 {
      %cst_17 = arith.constant 0.000000e+00 : f32
      %17 = vector.broadcast %cst_17 : f32 to vector<2x128xf32>
      %c0_18 = arith.constant 0 : index
      %c0_19 = arith.constant 0 : index
      %18 = vector.load %arg6[%c0_18, %c0_19] : memref<2x128xf32, #tpu.memory_space<vmem>>, vector<2x128xf32>
      tpu.vector_store %arg6[%c0_18, %c0_19], %17 {strides = array<i32>} : memref<2x128xf32, #tpu.memory_space<vmem>>, vector<2x128xf32>,
      %cst_20 = arith.constant 0.000000e+00 : f32
      %19 = vector.broadcast %cst_20 : f32 to vector<2x128xf32>
      %c0_21 = arith.constant 0 : index
      %c0_22 = arith.constant 0 : index
      %20 = vector.load %arg7[%c0_21, %c0_22] : memref<2x128xf32, #tpu.memory_space<vmem>>, vector<2x128xf32>
      tpu.vector_store %arg7[%c0_21, %c0_22], %19 {strides = array<i32>} : memref<2x128xf32, #tpu.memory_space<vmem>>, vector<2x128xf32>,
    } else {
    }
    %c0 = arith.constant 0 : index
    %c0_1 = arith.constant 0 : index
    %3 = vector.load %arg1[%c0, %c0_1] : memref<2x256xbf16, #tpu.memory_space<vmem>>, vector<2x256xbf16>
    %c0_2 = arith.constant 0 : index
    %c0_3 = arith.constant 0 : index
    %4 = vector.load %arg6[%c0_2, %c0_3] : memref<2x128xf32, #tpu.memory_space<vmem>>, vector<2x128xf32>
    %c0_4 = arith.constant 0 : index
    %c0_5 = arith.constant 0 : index
    %5 = vector.load %arg2[%c0_4, %c0_5] : memref<256x128xbf16, #tpu.memory_space<vmem>>, vector<256x128xbf16>
    %cst = arith.constant dense<0.000000e+00> : vector<2x128xf32>
    %6 = tpu.matmul %3, %5, %cst {dimension_numbers = #tpu.dot_dimension_numbers<[1], [0], [0], [1], [0, 0, 1, 1], [], []>} : vector<2x256xbf16>, vector<256x128xbf16>, vector<2x128xf32> -> vector<2x128xf32>
    %7 = arith.addf %4, %6 : vector<2x128xf32>
    %c0_6 = arith.constant 0 : index
    %c0_7 = arith.constant 0 : index
    %8 = vector.load %arg6[%c0_6, %c0_7] : memref<2x128xf32, #tpu.memory_space<vmem>>, vector<2x128xf32>
    tpu.vector_store %arg6[%c0_6, %c0_7], %7 {strides = array<i32>} : memref<2x128xf32, #tpu.memory_space<vmem>>, vector<2x128xf32>,
    %c0_8 = arith.constant 0 : index
    %c0_9 = arith.constant 0 : index
    %9 = vector.load %arg7[%c0_8, %c0_9] : memref<2x128xf32, #tpu.memory_space<vmem>>, vector<2x128xf32>
    %c0_10 = arith.constant 0 : index
    %c0_11 = arith.constant 0 : index
    %10 = vector.load %arg3[%c0_10, %c0_11] : memref<256x128xbf16, #tpu.memory_space<vmem>>, vector<256x128xbf16>
    %cst_12 = arith.constant dense<0.000000e+00> : vector<2x128xf32>
    %11 = tpu.matmul %3, %10, %cst_12 {dimension_numbers = #tpu.dot_dimension_numbers<[1], [0], [0], [1], [0, 0, 1, 1], [], []>} : vector<2x256xbf16>, vector<256x128xbf16>, vector<2x128xf32> -> vector<2x128xf32>
    %12 = arith.addf %9, %11 : vector<2x128xf32>
    %c0_13 = arith.constant 0 : index
    %c0_14 = arith.constant 0 : index
    %13 = vector.load %arg7[%c0_13, %c0_14] : memref<2x128xf32, #tpu.memory_space<vmem>>, vector<2x128xf32>
    tpu.vector_store %arg7[%c0_13, %c0_14], %12 {strides = array<i32>} : memref<2x128xf32, #tpu.memory_space<vmem>>, vector<2x128xf32>,
    %c0_i32_15 = arith.constant 0 : i32
    %14 = arith.cmpi eq, %arg0, %c0_i32_15 : i32
    %15 = arith.extui %14 : i1 to i32
    %c0_i32_16 = arith.constant 0 : i32
    %16 = arith.cmpi ne, %15, %c0_i32_16 : i32
    scf.if %16 {
      %c0_17 = arith.constant 0 : index
      %c0_18 = arith.constant 0 : index
      %17 = vector.load %arg6[%c0_17, %c0_18] : memref<2x128xf32, #tpu.memory_space<vmem>>, vector<2x128xf32>
      %c0_19 = arith.constant 0 : index
      %c0_20 = arith.constant 0 : index
      %18 = vector.load %arg4[%c0_19, %c0_20] : memref<2x128xf32, #tpu.memory_space<vmem>>, vector<2x128xf32>
      tpu.vector_store %arg4[%c0_19, %c0_20], %17 {strides = array<i32>} : memref<2x128xf32, #tpu.memory_space<vmem>>, vector<2x128xf32>,
      %c0_21 = arith.constant 0 : index
      %c0_22 = arith.constant 0 : index
      %19 = vector.load %arg7[%c0_21, %c0_22] : memref<2x128xf32, #tpu.memory_space<vmem>>, vector<2x128xf32>
      %c0_23 = arith.constant 0 : index
      %c0_24 = arith.constant 0 : index
      %20 = vector.load %arg5[%c0_23, %c0_24] : memref<2x128xf32, #tpu.memory_space<vmem>>, vector<2x128xf32>
      tpu.vector_store %arg5[%c0_23, %c0_24], %19 {strides = array<i32>} : memref<2x128xf32, #tpu.memory_space<vmem>>, vector<2x128xf32>,
    } else {
    }
    return
  }
  func.func @transform_0(%arg0: i32) -> (i32, i32) {
    %c0_i32 = arith.constant 0 : i32
    %c0_i32_0 = arith.constant 0 : i32
    return %c0_i32, %arg0 : i32, i32
  }
  func.func @transform_1(%arg0: i32) -> (i32, i32) {
    %c0_i32 = arith.constant 0 : i32
    %c0_i32_0 = arith.constant 0 : i32
    return %arg0, %c0_i32 : i32, i32
  }
  func.func @transform_2(%arg0: i32) -> (i32, i32) {
    %c0_i32 = arith.constant 0 : i32
    %c0_i32_0 = arith.constant 0 : i32
    return %arg0, %c0_i32 : i32, i32
  }
  func.func @transform_3(%arg0: i32) -> (i32, i32) {
    %c0_i32 = arith.constant 0 : i32
    %c0_i32_0 = arith.constant 0 : i32
    %c0_i32_1 = arith.constant 0 : i32
    return %c0_i32, %c0_i32_0 : i32, i32
  }
  func.func @transform_4(%arg0: i32) -> (i32, i32) {
    %c0_i32 = arith.constant 0 : i32
    %c0_i32_0 = arith.constant 0 : i32
    %c0_i32_1 = arith.constant 0 : i32
    return %c0_i32, %c0_i32_0 : i32, i32
  }
}

</mosaic_0001>

<bundles_post_ra>
// kernel: gcn_forward.5
= control target key start
LH: loop header
LB: loop body
LE: loop exit
PB: predicated region body
PF: predicated region fallthrough
CT: control target
= control target key end

     0   :  { %v517_v23 = vmov 1966171168   ;;  %v69_v25 = vlaneseq  ;;  %v518_v42 = vmov 0.0   ;;  %s649_s1 = inlined_call_operand.vmem [shape: bf16[256,128], index: 1, kind: input, shape index: {}]   ;;  %s650_s2 = inlined_call_operand.vmem [shape: bf16[256,128], index: 2, kind: input, shape index: {}]   ;;  %s651_s0 = inlined_call_operand.vmem [shape: bf16[2,256], index: 0, kind: input, shape index: {}]   ;;  %s652_s3 = inlined_call_operand.vmem [shape: f32[2,128], index: 3, kind: output, shape index: {0}]   ;;  %s653_s4 = inlined_call_operand.vmem [shape: f32[2,128], index: 4, kind: output, shape index: {1}]  }
   0x1   :  { %v485_v0 = vld [vmem:[%s649_s1 + $0x40] sm:$0xff]   ;;  %v489_v4 = vld [vmem:[%s649_s1 + $0x48] sm:$0xff]   ;;  %v493_v8 = vld [vmem:[%s649_s1 + $0x50] sm:$0xff]   ;;  %v67_v24 = vunpack.c.l.s4 %v517_v23  ;;  %21 = vst [vmem:[#allocation2] sm:$0x3] %v518_v42 }
   0x2   :  { %v486_v1 = vld [vmem:[%s650_s2 + $0x40] sm:$0xff]   ;;  %439 = vmatprep.subr.bf16.mxu0 %v485_v0  ;;  %v490_v5 = vld [vmem:[%s650_s2 + $0x48] sm:$0xff]   ;;  %v494_v9 = vld [vmem:[%s650_s2 + $0x50] sm:$0xff]   ;;  %v70_v31 = vshrl.u32 %v69_v25, 7  ;;  %22 = vst [vmem:[#allocation3] sm:$0x3] %v518_v42 }
   0x3   :  { %v487_v2 = vld [vmem:[%s649_s1] sm:$0xff]   ;;  %461 = vmatprep.subr.bf16.mxu1 %v486_v1  ;;  %v491_v6 = vld [vmem:[%s649_s1 + $0x8] sm:$0xff]   ;;  %v495_v10 = vld [vmem:[%s649_s1 + $0x10] sm:$0xff]   ;;  %v68_v30 = vunpack.c.0.s8 %v67_v24 }
   0x4   :  { %v488_v3 = vld [vmem:[%s650_s2] sm:$0xff]   ;;  %440 = vmatpush3.bf16.msra.mxu0 %v487_v2  ;;  %v492_v7 = vld [vmem:[%s650_s2 + $0x8] sm:$0xff]   ;;  %v496_v11 = vld [vmem:[%s650_s2 + $0x10] sm:$0xff]  }
   0x5   :  { %462 = vmatpush3.bf16.msra.mxu1 %v488_v3  ;;  %441 = vmatprep.subr.bf16.mxu0 %v489_v4  ;;  %v497_v12 = vld [vmem:[%s649_s1 + $0x58] sm:$0xff]   ;;  %v501_v16 = vld [vmem:[%s649_s1 + $0x60] sm:$0xff]   ;;  %v505_v20 = vld [vmem:[%s649_s1 + $0x68] sm:$0xff]   ;;  %v71_v36 = vsub.s32 %v68_v30, %v70_v31 }
   0x6   :  { %463 = vmatprep.subr.bf16.mxu1 %v490_v5  ;;  %v498_v13 = vld [vmem:[%s650_s2 + $0x58] sm:$0xff]   ;;  %v502_v17 = vld [vmem:[%s650_s2 + $0x60] sm:$0xff]   ;;  %v506_v21 = vld [vmem:[%s650_s2 + $0x68] sm:$0xff]  }
   0x7   :  { %v499_v14 = vld [vmem:[%s649_s1 + $0x18] sm:$0xff]   ;;  %v503_v18 = vld [vmem:[%s649_s1 + $0x20] sm:$0xff]   ;;  %v507_v22 = vld [vmem:[%s649_s1 + $0x28] sm:$0xff]  }
   0x8   :  { %442 = vmatpush3.bf16.msra.mxu0 %v491_v6  ;;  %v500_v15 = vld [vmem:[%s650_s2 + $0x18] sm:$0xff]   ;;  %v504_v19 = vld [vmem:[%s650_s2 + $0x20] sm:$0xff]   ;;  %v508_v26 = vld [vmem:[%s650_s2 + $0x28] sm:$0xff]  }
   0x9   :  { %464 = vmatpush3.bf16.msra.mxu1 %v492_v7  ;;  %443 = vmatprep.subr.bf16.mxu0 %v493_v8  ;;  %v509_v27 = vld [vmem:[%s649_s1 + $0x70] sm:$0xff]   ;;  %v513_v33 = vld [vmem:[%s649_s1 + $0x78] sm:$0xff]   ;;  %v406_v38 = vld.sshfl [vmem:[%s651_s0] sm:$0x11 pattern:$0x75316420] }
   0xa   :  { %465 = vmatprep.subr.bf16.mxu1 %v494_v9  ;;  %v510_v28 = vld [vmem:[%s650_s2 + $0x70] sm:$0xff]   ;;  %v514_v34 = vld [vmem:[%s650_s2 + $0x78] sm:$0xff]   ;;  %v65_v39 = vcombine.high %v406_v38, %v406_v38  ;;  %v72_v40 = vrot.slane %v406_v38, %v71_v36  ;;  %v24_v45 = vld [vmem:[#allocation2] sm:$0x3] }
   0xb   :  { %v511_v29 = vld [vmem:[%s649_s1 + $0x30] sm:$0xff]   ;;  %v515_v35 = vld [vmem:[%s649_s1 + $0x38] sm:$0xff]   ;;  %v220_v47 = vld [vmem:[#allocation3] sm:$0x3] }
   0xc   :  { %444 = vmatpush3.bf16.msra.mxu0 %v495_v10  ;;  %v512_v32 = vld [vmem:[%s650_s2 + $0x30] sm:$0xff]   ;;  %v516_v37 = vld [vmem:[%s650_s2 + $0x38] sm:$0xff]   ;;  %v79_v41 = vrot.slane %v65_v39, %v71_v36 }
   0xd   :  { %466 = vmatpush3.bf16.msra.mxu1 %v496_v11  ;;  %445 = vmatprep.subr.bf16.mxu0 %v497_v12 }
   0xe   :  { %467 = vmatprep.subr.bf16.mxu1 %v498_v13  ;;  %210 = vmatprep.mubr.bf16.mxu0 %v79_v41 }
   0xf   :  { %381 = vmatprep.mubr.bf16.mxu1 %v79_v41 }
  0x10   :  { %446 = vmatpush3.bf16.msra.mxu0 %v499_v14 }
  0x11   :  { %468 = vmatpush3.bf16.msra.mxu1 %v500_v15  ;;  %447 = vmatprep.subr.bf16.mxu0 %v501_v16 }
  0x12   :  { %469 = vmatprep.subr.bf16.mxu1 %v502_v17 }
  0x14   :  { %448 = vmatpush3.bf16.msra.mxu0 %v503_v18 }
  0x15   :  { %470 = vmatpush3.bf16.msra.mxu1 %v504_v19  ;;  %449 = vmatprep.subr.bf16.mxu0 %v505_v20 }
  0x16   :  { %471 = vmatprep.subr.bf16.mxu1 %v506_v21 }
  0x18   :  { %450 = vmatpush3.bf16.msra.mxu0 %v507_v22 }
  0x19   :  { %472 = vmatpush3.bf16.msra.mxu1 %v508_v26  ;;  %451 = vmatprep.subr.bf16.mxu0 %v509_v27 }
  0x1a   :  { %473 = vmatprep.subr.bf16.mxu1 %v510_v28 }
  0x1c   :  { %452 = vmatpush3.bf16.msra.mxu0 %v511_v29 }
  0x1d   :  { %474 = vmatpush3.bf16.msra.mxu1 %v512_v32  ;;  %453 = vmatprep.subr.bf16.mxu0 %v513_v33 }
  0x1e   :  { %475 = vmatprep.subr.bf16.mxu1 %v514_v34 }
  0x20   :  { %454 = vmatpush3.bf16.msra.mxu0 %v515_v35 }
  0x21   :  { %476 = vmatpush3.bf16.msra.mxu1 %v516_v37 }
  0x23   :  { %211 = vmatmul.mubr.bf16.vlgmr.msra.gmra.mrb[0].mxu0 %v72_v40 }
  0x24   :  { %382 = vmatmul.mubr.bf16.vlgmr.msra.gmra.mrb[0].mxu1 %v72_v40 }
  0xf6   :  { %v455_v43 = vpop.f32.mrb[0].mxu0 }
  0xf7   :  { %v477_v44 = vpop.f32.mrb[0].mxu1  ;;  %v456_v46 = vpop.f32.mrb[1].mxu0 }
  0xf8   :  { %v478_v48 = vpop.f32.mrb[1].mxu1  ;;  %v457_v49 = vadd.f32 %v456_v46, %v455_v43  ;;  %v458_v51 = vpop.f32.mrb[2].mxu0 }
  0xf9   :  { %v479_v50 = vadd.f32 %v478_v48, %v477_v44  ;;  %v480_v52 = vpop.f32.mrb[2].mxu1  ;;  %v459_v53 = vpop.f32.mrb[3].mxu0 }
  0xfa   :  { %v481_v54 = vpop.f32.mrb[3].mxu1  ;;  %v218_v55 = vadd.f32 %v457_v49, %v24_v45 }
  0xfb   :  { %v389_v56 = vadd.f32 %v479_v50, %v220_v47 }
  0xfc   :  { %219 = vst [vmem:[#allocation2] sm:$0x3] %v218_v55 }
  0xfd   :  { %390 = vst [vmem:[#allocation3] sm:$0x3] %v389_v56 }
 0x103   :  { %v394_v57 = vld [vmem:[#allocation2] sm:$0x3] }
 0x104   :  { %v396_v58 = vld [vmem:[#allocation3] sm:$0x3]  ;;  %395 = vst [vmem:[%s652_s3] sm:$0x3] %v394_v57 }
 0x105   :  { %397 = vst [vmem:[%s653_s4] sm:$0x3] %v396_v58 }

// kernel: gcn_forward.4
= control target key start
LH: loop header
LB: loop body
LE: loop exit
PB: predicated region body
PF: predicated region fallthrough
CT: control target
= control target key end

     0   :  { %s1547_s1 = inlined_call_operand.vmem [shape: bf16[256,128], index: 1, kind: input, shape index: {}]   ;;  %s1548_s0 = inlined_call_operand.vmem [shape: bf16[256,256], index: 0, kind: input, shape index: {}]   ;;  %s1549_s2 = inlined_call_operand.vmem [shape: f32[1,128], index: 2, kind: input, shape index: {}]   ;;  %s1550_s3 = inlined_call_operand.vmem [shape: bf16[256,128], index: 3, kind: output, shape index: {}]  }
   0x1   :  { %v1234_v0 = vld [vmem:[%s1547_s1 + $0x40] sm:$0xff]   ;;  %v1236_v2 = vld [vmem:[%s1547_s1 + $0x48] sm:$0xff]   ;;  %v1238_v4 = vld [vmem:[%s1547_s1 + $0x50] sm:$0xff]  }
   0x2   :  { %v1235_v1 = vld [vmem:[%s1547_s1] sm:$0xff]   ;;  %1106 = vmatprep.subr.bf16.mxu0 %v1234_v0  ;;  %1218 = vmatprep.subr.bf16.mxu1 %v1234_v0  ;;  %v1237_v3 = vld [vmem:[%s1547_s1 + $0x8] sm:$0xff]   ;;  %v1239_v5 = vld [vmem:[%s1547_s1 + $0x10] sm:$0xff]  }
   0x3   :  { %1107 = vmatpush3.bf16.msra.mxu0 %v1235_v1  ;;  %1226 = vmatpush3.bf16.msra.mxu1 %v1235_v1  ;;  %v1240_v6 = vld [vmem:[%s1547_s1 + $0x58] sm:$0xff]   ;;  %v1242_v8 = vld [vmem:[%s1547_s1 + $0x60] sm:$0xff]   ;;  %v1244_v10 = vld [vmem:[%s1547_s1 + $0x68] sm:$0xff]  }
   0x4   :  { %1108 = vmatprep.subr.bf16.mxu0 %v1236_v2  ;;  %1219 = vmatprep.subr.bf16.mxu1 %v1236_v2  ;;  %v1241_v7 = vld [vmem:[%s1547_s1 + $0x18] sm:$0xff]   ;;  %v1243_v9 = vld [vmem:[%s1547_s1 + $0x20] sm:$0xff]   ;;  %v1245_v13 = vld [vmem:[%s1547_s1 + $0x28] sm:$0xff]  }
   0x5   :  { %v1252_v11 = vld [vmem:[%s1548_s0 + $0x4] ss:$8 sps:$4 sm:$0xff]   ;;  %v1246_v14 = vld [vmem:[%s1547_s1 + $0x70] sm:$0xff]   ;;  %v1248_v16 = vld [vmem:[%s1547_s1 + $0x78] sm:$0xff]  }
   0x6   :  { %v1255_v12 = vld [vmem:[%s1548_s0 + $0x84] ss:$8 sps:$4 sm:$0xff]   ;;  %435 = vmatprep.mubr.bf16.mxu0 %v1252_v11  ;;  %v1247_v15 = vld [vmem:[%s1547_s1 + $0x30] sm:$0xff]   ;;  %v1249_v17 = vld [vmem:[%s1547_s1 + $0x38] sm:$0xff]  }
   0x7   :  { %1109 = vmatpush3.bf16.msra.mxu0 %v1237_v3  ;;  %1227 = vmatpush3.bf16.msra.mxu1 %v1237_v3  ;;  %v1250_v18 = vld [vmem:[%s1548_s0] ss:$8 sps:$4 sm:$0xff]   ;;  %v1256_v20 = vld [vmem:[%s1548_s0 + $0x14] ss:$8 sps:$4 sm:$0xff]   ;;  %v1260_v22 = vld [vmem:[%s1548_s0 + $0x10] ss:$8 sps:$4 sm:$0xff]  }
   0x8   :  { %1110 = vmatprep.subr.bf16.mxu0 %v1238_v4  ;;  %1220 = vmatprep.subr.bf16.mxu1 %v1238_v4  ;;  %v1253_v19 = vld [vmem:[%s1548_s0 + $0x80] ss:$8 sps:$4 sm:$0xff]   ;;  %v1258_v21 = vld [vmem:[%s1548_s0 + $0x94] ss:$8 sps:$4 sm:$0xff]   ;;  %v1261_v23 = vld [vmem:[%s1548_s0 + $0x90] ss:$8 sps:$4 sm:$0xff]  }
   0x9   :  { %499 = vmatprep.mubr.bf16.mxu1 %v1255_v12  ;;  %v1262_v24 = vld [vmem:[%s1548_s0 + $0x24] ss:$8 sps:$4 sm:$0xff]   ;;  %v1266_v26 = vld [vmem:[%s1548_s0 + $0x20] ss:$8 sps:$4 sm:$0xff]   ;;  %v1268_v28 = vld [vmem:[%s1548_s0 + $0x34] ss:$8 sps:$4 sm:$0xff]  }
   0xa   :  { %v1264_v25 = vld [vmem:[%s1548_s0 + $0xa4] ss:$8 sps:$4 sm:$0xff]   ;;  %v1267_v27 = vld [vmem:[%s1548_s0 + $0xa0] ss:$8 sps:$4 sm:$0xff]   ;;  %v1270_v29 = vld [vmem:[%s1548_s0 + $0xb4] ss:$8 sps:$4 sm:$0xff]  }
   0xb   :  { %1111 = vmatpush3.bf16.msra.mxu0 %v1239_v5  ;;  %1228 = vmatpush3.bf16.msra.mxu1 %v1239_v5  ;;  %v1272_v30 = vld [vmem:[%s1548_s0 + $0x30] ss:$8 sps:$4 sm:$0xff]   ;;  %v1274_v32 = vld [vmem:[%s1548_s0 + $0x44] ss:$8 sps:$4 sm:$0xff]   ;;  %v1278_v34 = vld [vmem:[%s1548_s0 + $0x40] ss:$8 sps:$4 sm:$0xff]  }
   0xc   :  { %1112 = vmatprep.subr.bf16.mxu0 %v1240_v6  ;;  %1221 = vmatprep.subr.bf16.mxu1 %v1240_v6  ;;  %v1273_v31 = vld [vmem:[%s1548_s0 + $0xb0] ss:$8 sps:$4 sm:$0xff]   ;;  %v1276_v33 = vld [vmem:[%s1548_s0 + $0xc4] ss:$8 sps:$4 sm:$0xff]   ;;  %v1279_v35 = vld [vmem:[%s1548_s0 + $0xc0] ss:$8 sps:$4 sm:$0xff]  }
   0xd   :  { %v1280_v36 = vld [vmem:[%s1548_s0 + $0x54] ss:$8 sps:$4 sm:$0xff]   ;;  %v1284_v38 = vld [vmem:[%s1548_s0 + $0x50] ss:$8 sps:$4 sm:$0xff]   ;;  %v1286_v40 = vld [vmem:[%s1548_s0 + $0x64] ss:$8 sps:$4 sm:$0xff]  }
   0xe   :  { %v1282_v37 = vld [vmem:[%s1548_s0 + $0xd4] ss:$8 sps:$4 sm:$0xff]   ;;  %v1285_v39 = vld [vmem:[%s1548_s0 + $0xd0] ss:$8 sps:$4 sm:$0xff]   ;;  %v1288_v41 = vld [vmem:[%s1548_s0 + $0xe4] ss:$8 sps:$4 sm:$0xff]  }
   0xf   :  { %1113 = vmatpush3.bf16.msra.mxu0 %v1241_v7  ;;  %1229 = vmatpush3.bf16.msra.mxu1 %v1241_v7  ;;  %v1290_v42 = vld [vmem:[%s1548_s0 + $0x60] ss:$8 sps:$4 sm:$0xff]   ;;  %v1292_v44 = vld [vmem:[%s1548_s0 + $0x74] ss:$8 sps:$4 sm:$0xff]   ;;  %v1296_v46 = vld [vmem:[%s1548_s0 + $0x70] ss:$8 sps:$4 sm:$0xff]  }
  0x10   :  { %1114 = vmatprep.subr.bf16.mxu0 %v1242_v8  ;;  %1222 = vmatprep.subr.bf16.mxu1 %v1242_v8  ;;  %v1291_v43 = vld [vmem:[%s1548_s0 + $0xe0] ss:$8 sps:$4 sm:$0xff]   ;;  %v1294_v45 = vld [vmem:[%s1548_s0 + $0xf4] ss:$8 sps:$4 sm:$0xff]   ;;  %v1297_v47 = vld [vmem:[%s1548_s0 + $0xf0] ss:$8 sps:$4 sm:$0xff]  }
  0x11   :  { %v1465_v51 = vld [vmem:[%s1549_s2] ss:$0 sm:$0xff] }
  0x13   :  { %1115 = vmatpush3.bf16.msra.mxu0 %v1243_v9  ;;  %1230 = vmatpush3.bf16.msra.mxu1 %v1243_v9 }
  0x14   :  { %1116 = vmatprep.subr.bf16.mxu0 %v1244_v10  ;;  %1223 = vmatprep.subr.bf16.mxu1 %v1244_v10 }
  0x17   :  { %1117 = vmatpush3.bf16.msra.mxu0 %v1245_v13  ;;  %1231 = vmatpush3.bf16.msra.mxu1 %v1245_v13 }
  0x18   :  { %1118 = vmatprep.subr.bf16.mxu0 %v1246_v14  ;;  %1224 = vmatprep.subr.bf16.mxu1 %v1246_v14 }
  0x1b   :  { %1119 = vmatpush3.bf16.msra.mxu0 %v1247_v15  ;;  %1232 = vmatpush3.bf16.msra.mxu1 %v1247_v15 }
  0x1c   :  { %1120 = vmatprep.subr.bf16.mxu0 %v1248_v16  ;;  %1225 = vmatprep.subr.bf16.mxu1 %v1248_v16 }
  0x1f   :  { %1121 = vmatpush3.bf16.msra.mxu0 %v1249_v17  ;;  %1233 = vmatpush3.bf16.msra.mxu1 %v1249_v17 }
  0x22   :  { %436 = vmatmul.mubr.bf16.vlgmr.msra.gmra.mrb[0].mxu0 %v1250_v18  ;;  %500 = vmatmul.mubr.bf16.vlgmr.msra.gmra.mrb[0].mxu1 %v1253_v19 }
  0x23   :  { %443 = vmatprep.mubr.bf16.mxu0 %v1256_v20  ;;  %507 = vmatprep.mubr.bf16.mxu1 %v1258_v21 }
  0x2a   :  { %444 = vmatmul.mubr.bf16.gmra.mrb[4].mxu0 %v1260_v22  ;;  %508 = vmatmul.mubr.bf16.gmra.mrb[4].mxu1 %v1261_v23 }
  0x2b   :  { %451 = vmatprep.mubr.bf16.mxu0 %v1262_v24  ;;  %515 = vmatprep.mubr.bf16.mxu1 %v1264_v25 }
  0x32   :  { %452 = vmatmul.mubr.bf16.gmra.mrb[8].mxu0 %v1266_v26  ;;  %516 = vmatmul.mubr.bf16.gmra.mrb[8].mxu1 %v1267_v27 }
  0x33   :  { %459 = vmatprep.mubr.bf16.mxu0 %v1268_v28  ;;  %523 = vmatprep.mubr.bf16.mxu1 %v1270_v29 }
  0x3a   :  { %460 = vmatmul.mubr.bf16.gmra.mrb[12].mxu0 %v1272_v30  ;;  %524 = vmatmul.mubr.bf16.gmra.mrb[12].mxu1 %v1273_v31 }
  0x3b   :  { %467 = vmatprep.mubr.bf16.mxu0 %v1274_v32  ;;  %531 = vmatprep.mubr.bf16.mxu1 %v1276_v33 }
  0x42   :  { %468 = vmatmul.mubr.bf16.gmra.mrb[16].mxu0 %v1278_v34  ;;  %532 = vmatmul.mubr.bf16.gmra.mrb[16].mxu1 %v1279_v35 }
  0x43   :  { %475 = vmatprep.mubr.bf16.mxu0 %v1280_v36  ;;  %539 = vmatprep.mubr.bf16.mxu1 %v1282_v37 }
  0x4a   :  { %476 = vmatmul.mubr.bf16.gmra.mrb[20].mxu0 %v1284_v38  ;;  %540 = vmatmul.mubr.bf16.gmra.mrb[20].mxu1 %v1285_v39 }
  0x4b   :  { %483 = vmatprep.mubr.bf16.mxu0 %v1286_v40  ;;  %547 = vmatprep.mubr.bf16.mxu1 %v1288_v41 }
  0x52   :  { %484 = vmatmul.mubr.bf16.gmra.mrb[24].mxu0 %v1290_v42  ;;  %548 = vmatmul.mubr.bf16.gmra.mrb[24].mxu1 %v1291_v43 }
  0x53   :  { %491 = vmatprep.mubr.bf16.mxu0 %v1292_v44  ;;  %555 = vmatprep.mubr.bf16.mxu1 %v1294_v45 }
  0x5a   :  { %492 = vmatmul.mubr.bf16.gmra.mrb[28].mxu0 %v1296_v46  ;;  %556 = vmatmul.mubr.bf16.gmra.mrb[28].mxu1 %v1297_v47 }
  0xf5   :  { %v1122_v48 = vpop.f32.mrb[0].mxu0  ;;  %v1170_v49 = vpop.f32.mrb[0].mxu1 }
  0xf6   :  { %v1123_v50 = vpop.f32.mrb[1].mxu0  ;;  %v1171_v52 = vpop.f32.mrb[1].mxu1 }
  0xf7   :  { %v1124_v53 = vadd.f32 %v1123_v50, %v1122_v48  ;;  %v1172_v54 = vadd.f32 %v1171_v52, %v1170_v49  ;;  %v1125_v55 = vpop.f32.mrb[2].mxu0  ;;  %v1173_v56 = vpop.f32.mrb[2].mxu1 }
  0xf8   :  { %v1126_v57 = vpop.f32.mrb[3].mxu0  ;;  %v1174_v58 = vpop.f32.mrb[3].mxu1 }
  0xf9   :  { %v670_v59 = vadd.f32 %v1124_v53, %v1465_v51  ;;  %v686_v60 = vadd.f32 %v1172_v54, %v1465_v51  ;;  %v1127_v61 = vadd.f32 %v1126_v57, %v1125_v55  ;;  %v1175_v62 = vadd.f32 %v1174_v58, %v1173_v56 }
  0xfb   :  { %v671_v63 = vadd.f32 %v1127_v61, %v1465_v51  ;;  %v687_v0 = vadd.f32 %v1175_v62, %v1465_v51  ;;  %v702_v1 = vmax.f32 %v670_v59, 0.0  ;;  %v718_v2 = vmax.f32 %v686_v60, 0.0 }
  0xfd   :  { %v703_v3 = vmax.f32 %v671_v63, 0.0  ;;  %v719_v4 = vmax.f32 %v687_v0, 0.0  ;;  %v1128_v5 = vpop.f32.mrb[4].mxu0  ;;  %v1176_v6 = vpop.f32.mrb[4].mxu1 }
  0xfe   :  { %v1129_v7 = vpop.f32.mrb[5].mxu0  ;;  %v1177_v8 = vpop.f32.mrb[5].mxu1 }
  0xff   :  { %v1014_v9 = vpack.c.bf16 %v703_v3, %v702_v1  ;;  %v1054_v10 = vpack.c.bf16 %v719_v4, %v718_v2  ;;  %v1130_v11 = vadd.f32 %v1129_v7, %v1128_v5  ;;  %v1178_v12 = vadd.f32 %v1177_v8, %v1176_v6  ;;  %v1131_v13 = vpop.f32.mrb[6].mxu0  ;;  %v1179_v14 = vpop.f32.mrb[6].mxu1 }
 0x100   :  { %v1132_v15 = vpop.f32.mrb[7].mxu0  ;;  %v1180_v16 = vpop.f32.mrb[7].mxu1 }
 0x101   :  { %1015 = vst [vmem:[%s1550_s3] sm:$0xff] %v1014_v9   ;;  %1098 = vst [vmem:[%s1550_s3 + $0x40] sm:$0xff] %v1054_v10   ;;  %v672_v17 = vadd.f32 %v1130_v11, %v1465_v51  ;;  %v688_v18 = vadd.f32 %v1178_v12, %v1465_v51  ;;  %v1133_v19 = vadd.f32 %v1132_v15, %v1131_v13 }
 0x102   :  { %v1181_v20 = vadd.f32 %v1180_v16, %v1179_v14 }
 0x103   :  { %v673_v21 = vadd.f32 %v1133_v19, %v1465_v51  ;;  %v704_v23 = vmax.f32 %v672_v17, 0.0  ;;  %v720_v24 = vmax.f32 %v688_v18, 0.0 }
 0x104   :  { %v689_v22 = vadd.f32 %v1181_v20, %v1465_v51 }
 0x105   :  { %v705_v25 = vmax.f32 %v673_v21, 0.0  ;;  %v1134_v27 = vpop.f32.mrb[8].mxu0  ;;  %v1182_v28 = vpop.f32.mrb[8].mxu1 }
 0x106   :  { %v721_v26 = vmax.f32 %v689_v22, 0.0  ;;  %v1135_v29 = vpop.f32.mrb[9].mxu0  ;;  %v1183_v30 = vpop.f32.mrb[9].mxu1 }
 0x107   :  { %v1019_v31 = vpack.c.bf16 %v705_v25, %v704_v23  ;;  %v1136_v33 = vadd.f32 %v1135_v29, %v1134_v27  ;;  %v1184_v34 = vadd.f32 %v1183_v30, %v1182_v28  ;;  %v1137_v35 = vpop.f32.mrb[10].mxu0  ;;  %v1185_v36 = vpop.f32.mrb[10].mxu1 }
 0x108   :  { %v1059_v32 = vpack.c.bf16 %v721_v26, %v720_v24  ;;  %v1138_v37 = vpop.f32.mrb[11].mxu0  ;;  %v1186_v38 = vpop.f32.mrb[11].mxu1 }
 0x109   :  { %1091 = vst [vmem:[%s1550_s3 + $0x8] sm:$0xff] %v1019_v31   ;;  %v674_v39 = vadd.f32 %v1136_v33, %v1465_v51  ;;  %v690_v40 = vadd.f32 %v1184_v34, %v1465_v51  ;;  %v1139_v41 = vadd.f32 %v1138_v37, %v1137_v35  ;;  %v1187_v42 = vadd.f32 %v1186_v38, %v1185_v36 }
 0x10a   :  { %1099 = vst [vmem:[%s1550_s3 + $0x48] sm:$0xff] %v1059_v32  }
 0x10b   :  { %v675_v43 = vadd.f32 %v1139_v41, %v1465_v51  ;;  %v691_v44 = vadd.f32 %v1187_v42, %v1465_v51  ;;  %v706_v45 = vmax.f32 %v674_v39, 0.0  ;;  %v722_v46 = vmax.f32 %v690_v40, 0.0 }
 0x10d   :  { %v707_v47 = vmax.f32 %v675_v43, 0.0  ;;  %v723_v48 = vmax.f32 %v691_v44, 0.0  ;;  %v1140_v49 = vpop.f32.mrb[12].mxu0  ;;  %v1188_v50 = vpop.f32.mrb[12].mxu1 }
 0x10e   :  { %v1141_v52 = vpop.f32.mrb[13].mxu0  ;;  %v1189_v53 = vpop.f32.mrb[13].mxu1 }
 0x10f   :  { %v1024_v54 = vpack.c.bf16 %v707_v47, %v706_v45  ;;  %v1064_v55 = vpack.c.bf16 %v723_v48, %v722_v46  ;;  %v1142_v56 = vadd.f32 %v1141_v52, %v1140_v49  ;;  %v1190_v57 = vadd.f32 %v1189_v53, %v1188_v50  ;;  %v1143_v58 = vpop.f32.mrb[14].mxu0  ;;  %v1191_v59 = vpop.f32.mrb[14].mxu1 }
 0x110   :  { %v1144_v60 = vpop.f32.mrb[15].mxu0  ;;  %v1192_v61 = vpop.f32.mrb[15].mxu1 }
 0x111   :  { %1092 = vst [vmem:[%s1550_s3 + $0x10] sm:$0xff] %v1024_v54   ;;  %1100 = vst [vmem:[%s1550_s3 + $0x50] sm:$0xff] %v1064_v55   ;;  %v676_v62 = vadd.f32 %v1142_v56, %v1465_v51  ;;  %v692_v63 = vadd.f32 %v1190_v57, %v1465_v51  ;;  %v1145_v0 = vadd.f32 %v1144_v60, %v1143_v58 }
 0x112   :  { %v1193_v1 = vadd.f32 %v1192_v61, %v1191_v59 }
 0x113   :  { %v677_v2 = vadd.f32 %v1145_v0, %v1465_v51  ;;  %v708_v4 = vmax.f32 %v676_v62, 0.0  ;;  %v724_v5 = vmax.f32 %v692_v63, 0.0 }
 0x114   :  { %v693_v3 = vadd.f32 %v1193_v1, %v1465_v51 }
 0x115   :  { %v709_v6 = vmax.f32 %v677_v2, 0.0  ;;  %v1146_v8 = vpop.f32.mrb[16].mxu0  ;;  %v1194_v9 = vpop.f32.mrb[16].mxu1 }
 0x116   :  { %v725_v7 = vmax.f32 %v693_v3, 0.0  ;;  %v1147_v10 = vpop.f32.mrb[17].mxu0  ;;  %v1195_v11 = vpop.f32.mrb[17].mxu1 }
 0x117   :  { %v1029_v12 = vpack.c.bf16 %v709_v6, %v708_v4  ;;  %v1148_v14 = vadd.f32 %v1147_v10, %v1146_v8  ;;  %v1196_v15 = vadd.f32 %v1195_v11, %v1194_v9  ;;  %v1149_v16 = vpop.f32.mrb[18].mxu0  ;;  %v1197_v17 = vpop.f32.mrb[18].mxu1 }
 0x118   :  { %v1069_v13 = vpack.c.bf16 %v725_v7, %v724_v5  ;;  %v1150_v18 = vpop.f32.mrb[19].mxu0  ;;  %v1198_v19 = vpop.f32.mrb[19].mxu1 }
 0x119   :  { %1093 = vst [vmem:[%s1550_s3 + $0x18] sm:$0xff] %v1029_v12   ;;  %v678_v20 = vadd.f32 %v1148_v14, %v1465_v51  ;;  %v694_v21 = vadd.f32 %v1196_v15, %v1465_v51  ;;  %v1151_v22 = vadd.f32 %v1150_v18, %v1149_v16  ;;  %v1199_v23 = vadd.f32 %v1198_v19, %v1197_v17 }
 0x11a   :  { %1101 = vst [vmem:[%s1550_s3 + $0x58] sm:$0xff] %v1069_v13  }
 0x11b   :  { %v679_v24 = vadd.f32 %v1151_v22, %v1465_v51  ;;  %v695_v25 = vadd.f32 %v1199_v23, %v1465_v51  ;;  %v710_v26 = vmax.f32 %v678_v20, 0.0  ;;  %v726_v27 = vmax.f32 %v694_v21, 0.0 }
 0x11d   :  { %v711_v28 = vmax.f32 %v679_v24, 0.0  ;;  %v727_v29 = vmax.f32 %v695_v25, 0.0  ;;  %v1152_v30 = vpop.f32.mrb[20].mxu0  ;;  %v1200_v31 = vpop.f32.mrb[20].mxu1 }
 0x11e   :  { %v1153_v32 = vpop.f32.mrb[21].mxu0  ;;  %v1201_v33 = vpop.f32.mrb[21].mxu1 }
 0x11f   :  { %v1034_v34 = vpack.c.bf16 %v711_v28, %v710_v26  ;;  %v1074_v35 = vpack.c.bf16 %v727_v29, %v726_v27  ;;  %v1154_v36 = vadd.f32 %v1153_v32, %v1152_v30  ;;  %v1202_v37 = vadd.f32 %v1201_v33, %v1200_v31  ;;  %v1155_v38 = vpop.f32.mrb[22].mxu0  ;;  %v1203_v39 = vpop.f32.mrb[22].mxu1 }
 0x120   :  { %v1156_v40 = vpop.f32.mrb[23].mxu0  ;;  %v1204_v41 = vpop.f32.mrb[23].mxu1 }
 0x121   :  { %1094 = vst [vmem:[%s1550_s3 + $0x20] sm:$0xff] %v1034_v34   ;;  %1102 = vst [vmem:[%s1550_s3 + $0x60] sm:$0xff] %v1074_v35   ;;  %v680_v42 = vadd.f32 %v1154_v36, %v1465_v51  ;;  %v696_v43 = vadd.f32 %v1202_v37, %v1465_v51  ;;  %v1157_v44 = vadd.f32 %v1156_v40, %v1155_v38 }
 0x122   :  { %v1205_v45 = vadd.f32 %v1204_v41, %v1203_v39 }
 0x123   :  { %v681_v46 = vadd.f32 %v1157_v44, %v1465_v51  ;;  %v712_v48 = vmax.f32 %v680_v42, 0.0  ;;  %v728_v49 = vmax.f32 %v696_v43, 0.0 }
 0x124   :  { %v697_v47 = vadd.f32 %v1205_v45, %v1465_v51 }
 0x125   :  { %v713_v50 = vmax.f32 %v681_v46, 0.0  ;;  %v1158_v53 = vpop.f32.mrb[24].mxu0  ;;  %v1206_v54 = vpop.f32.mrb[24].mxu1 }
 0x126   :  { %v729_v52 = vmax.f32 %v697_v47, 0.0  ;;  %v1159_v55 = vpop.f32.mrb[25].mxu0  ;;  %v1207_v56 = vpop.f32.mrb[25].mxu1 }
 0x127   :  { %v1039_v57 = vpack.c.bf16 %v713_v50, %v712_v48  ;;  %v1160_v59 = vadd.f32 %v1159_v55, %v1158_v53  ;;  %v1208_v60 = vadd.f32 %v1207_v56, %v1206_v54  ;;  %v1161_v61 = vpop.f32.mrb[26].mxu0  ;;  %v1209_v62 = vpop.f32.mrb[26].mxu1 }
 0x128   :  { %v1079_v58 = vpack.c.bf16 %v729_v52, %v728_v49  ;;  %v1162_v63 = vpop.f32.mrb[27].mxu0  ;;  %v1210_v0 = vpop.f32.mrb[27].mxu1 }
 0x129   :  { %1095 = vst [vmem:[%s1550_s3 + $0x28] sm:$0xff] %v1039_v57   ;;  %v682_v1 = vadd.f32 %v1160_v59, %v1465_v51  ;;  %v698_v2 = vadd.f32 %v1208_v60, %v1465_v51  ;;  %v1163_v3 = vadd.f32 %v1162_v63, %v1161_v61  ;;  %v1211_v4 = vadd.f32 %v1210_v0, %v1209_v62 }
 0x12a   :  { %1103 = vst [vmem:[%s1550_s3 + $0x68] sm:$0xff] %v1079_v58  }
 0x12b   :  { %v683_v5 = vadd.f32 %v1163_v3, %v1465_v51  ;;  %v699_v6 = vadd.f32 %v1211_v4, %v1465_v51  ;;  %v714_v7 = vmax.f32 %v682_v1, 0.0  ;;  %v730_v8 = vmax.f32 %v698_v2, 0.0 }
 0x12d   :  { %v715_v9 = vmax.f32 %v683_v5, 0.0  ;;  %v731_v10 = vmax.f32 %v699_v6, 0.0  ;;  %v1164_v11 = vpop.f32.mrb[28].mxu0  ;;  %v1212_v12 = vpop.f32.mrb[28].mxu1 }
 0x12e   :  { %v1165_v13 = vpop.f32.mrb[29].mxu0  ;;  %v1213_v14 = vpop.f32.mrb[29].mxu1 }
 0x12f   :  { %v1044_v15 = vpack.c.bf16 %v715_v9, %v714_v7  ;;  %v1084_v16 = vpack.c.bf16 %v731_v10, %v730_v8  ;;  %v1166_v17 = vadd.f32 %v1165_v13, %v1164_v11  ;;  %v1214_v18 = vadd.f32 %v1213_v14, %v1212_v12  ;;  %v1167_v19 = vpop.f32.mrb[30].mxu0  ;;  %v1215_v20 = vpop.f32.mrb[30].mxu1 }
 0x130   :  { %v1168_v21 = vpop.f32.mrb[31].mxu0  ;;  %v1216_v22 = vpop.f32.mrb[31].mxu1 }
 0x131   :  { %1096 = vst [vmem:[%s1550_s3 + $0x30] sm:$0xff] %v1044_v15   ;;  %1104 = vst [vmem:[%s1550_s3 + $0x70] sm:$0xff] %v1084_v16   ;;  %v684_v23 = vadd.f32 %v1166_v17, %v1465_v51  ;;  %v700_v24 = vadd.f32 %v1214_v18, %v1465_v51  ;;  %v1169_v25 = vadd.f32 %v1168_v21, %v1167_v19 }
 0x132   :  { %v1217_v26 = vadd.f32 %v1216_v22, %v1215_v20 }
 0x133   :  { %v685_v27 = vadd.f32 %v1169_v25, %v1465_v51  ;;  %v716_v29 = vmax.f32 %v684_v23, 0.0  ;;  %v732_v30 = vmax.f32 %v700_v24, 0.0 }
 0x134   :  { %v701_v28 = vadd.f32 %v1217_v26, %v1465_v51 }
 0x135   :  { %v717_v31 = vmax.f32 %v685_v27, 0.0 }
 0x136   :  { %v733_v32 = vmax.f32 %v701_v28, 0.0 }
 0x137   :  { %v1049_v33 = vpack.c.bf16 %v717_v31, %v716_v29 }
 0x138   :  { %v1089_v34 = vpack.c.bf16 %v733_v32, %v732_v30 }
 0x139   :  { %1097 = vst [vmem:[%s1550_s3 + $0x38] sm:$0xff] %v1049_v33  }
 0x13a   :  { %1105 = vst [vmem:[%s1550_s3 + $0x78] sm:$0xff] %v1089_v34  }

// kernel: gcn_forward.3
= control target key start
LH: loop header
LB: loop body
LE: loop exit
PB: predicated region body
PF: predicated region fallthrough
CT: control target
= control target key end

     0   :  { %12 = vsyncpa [#allocation4], 0  ;;  %s2251_s21 = smov [#allocation3]   ;;  %s2525_s0 = inlined_call_operand.hbm [shape: bf16[256,256], index: 0, kind: input, shape index: {}]   ;;  %s2526_s1 = inlined_call_operand.vmem [shape: bf16[256,8], index: 1, kind: input, shape index: {}]   ;;  %s2527_s2 = inlined_call_operand.vmem [shape: bf16[8,128], index: 2, kind: input, shape index: {}]   ;;  %s2528_s3 = inlined_call_operand.vmem [shape: f32[1,128], index: 3, kind: input, shape index: {}]   ;;  %s2529_s4 = inlined_call_operand.vmem [shape: bf16[128,128], index: 4, kind: input, shape index: {}]   ;;  %s2530_s5 = inlined_call_operand.vmem [shape: bf16[256,128], index: 5, kind: output, shape index: {0}]   ;;  %s2531_s6 = inlined_call_operand.vmem [shape: bf16[256,128], index: 6, kind: output, shape index: {1}]  }
   0x1   :  { %s18_s22 = sshll.u32 %s2251_s21, 4  ;;  %s2227_s25 = scalar_lea.hbm %s2525_s0, 4096  ;;  %s19_s22 = int_to_ptr.vmem [resolvable:$true] %s18_s22 }
   0x2   :  { %p2228_p0 = scmp.ne.s32.totalorder %s2525_s0, %s2227_s25  ;;  %p2231_p1 = scmp.lt.u32.totalorder %s2227_s25, %s2525_s0 }
   0x4   :  { %p2233_p2 = pnand %p2231_p1, %p2228_p0 }
   0x6   :  { %2236 = shalt.err (!%p2233_p2)
}
   0x7   :  { %s2237_s30 = scalar_lea.vmem %s19_s22, 4096  ;;  %p2242_p4 = scmp.lt.s32.totalorder %s19_s22, %s19_s22 }
   0x8   :  { %p2238_p3 = scmp.ne.s32.totalorder %s19_s22, %s2237_s30  ;;  %p2243_p5 = scmp.lt.s32.totalorder %s2237_s30, %s2237_s30 }
   0xa   :  { %p2244_p6 = por %p2243_p5, %p2242_p4 }
   0xc   :  { %p2245_p7 = pnand %p2244_p6, %p2238_p3 }
   0xe   :  { %2248 = shalt.err (!%p2245_p7)
}
   0xf   :  { %s2252_s7 = smov 128   ;;  %s2253_s8 = smov 8  }
  0x10   :  { %24 = dma.hbm_to_vmem [thread:$0]  %s2525_s0, 4096, %s19_s22, [#allocation4], %s2252_s7, %s2252_s7, %s2253_s8  }
  0x11   :  { %2249 = dma.done.wait [#allocation4], 4096  }
  0x12   :  { %2250 = vsyncadd [#allocation4], 4294963200  ;;  %vm235_vm0 = vcmask 1043456   ;;  %vm186_vm1 = vcmask 64512   ;;  %v105_v0 = vld [vmem:[%s2527_s2] sm:$0xf] }
  0x13   :  { %2151 = vmatprep.subr.msk.bf16.mxu0 %vm235_vm0, %v105_v0  ;;  %v237_v1 = vsel %vm235_vm0, %v105_v0, 0  ;;  %v2155_v2 = vld [vmem:[%s2526_s1] sm:$0xff]   ;;  %v2156_v3 = vld [vmem:[%s2526_s1 + $0x8] sm:$0xff]   ;;  %v2157_v4 = vld [vmem:[%s2526_s1 + $0x10] sm:$0xff]  }
  0x14   :  { %2070 = vmatpush3.bf16.msra.mxu0 %v237_v1  ;;  %2071 = vmatprep.mubr.msk.bf16.mxu0 %vm186_vm1, %v2155_v2  ;;  %v2158_v5 = vld [vmem:[%s2526_s1 + $0x18] sm:$0xff]   ;;  %v2159_v6 = vld [vmem:[%s2526_s1 + $0x20] sm:$0xff]   ;;  %v2160_v7 = vld [vmem:[%s2526_s1 + $0x28] sm:$0xff]  }
  0x15   :  { %v2161_v8 = vld [vmem:[%s2526_s1 + $0x30] sm:$0xff]   ;;  %v2162_v9 = vld [vmem:[%s2526_s1 + $0x38] sm:$0xff]   ;;  %v2163_v10 = vld [vmem:[%s2526_s1 + $0x40] sm:$0xff]  }
  0x16   :  { %v2164_v11 = vld [vmem:[%s2526_s1 + $0x48] sm:$0xff]   ;;  %v2165_v12 = vld [vmem:[%s2526_s1 + $0x50] sm:$0xff]   ;;  %v2166_v13 = vld [vmem:[%s2526_s1 + $0x58] sm:$0xff]  }
  0x17   :  { %2072 = vmatmul.mubr.msk.bf16.vlgmr.msra.gmra.mrb[0].mxu0 %vm186_vm1, %v2156_v3  ;;  %v2167_v14 = vld [vmem:[%s2526_s1 + $0x60] sm:$0xff]   ;;  %v2168_v15 = vld [vmem:[%s2526_s1 + $0x68] sm:$0xff]   ;;  %v2169_v16 = vld [vmem:[%s2526_s1 + $0x70] sm:$0xff]  }
  0x18   :  { %2075 = vmatprep.mubr.msk.bf16.mxu0 %vm186_vm1, %v2157_v4  ;;  %v2170_v17 = vld [vmem:[%s2526_s1 + $0x78] sm:$0xff]   ;;  %v2173_v18 = vld [vmem:[#allocation3 + $0x4] ss:$8 sps:$4 sm:$0xff]  }
  0x19   :  { %672 = vmatprep.mubr.bf16.mxu1 %v2173_v18  ;;  %v2219_v3 = vld [vmem:[%s2529_s4] sm:$0xff]   ;;  %v2220_v4 = vld [vmem:[%s2529_s4 + $0x8] sm:$0xff]  }
  0x1a   :  { %2103 = vmatprep.subr.bf16.mxu0 %v2219_v3  ;;  %v2191_v18 = vld [vmem:[#allocation3 + $0x60] ss:$8 sps:$4 sm:$0xff]  }
  0x1b   :  { %2104 = vmatpush3.bf16.msra.mxu0 %v2219_v3 }
  0x1c   :  { %2105 = vmatprep.subr.bf16.mxu0 %v2220_v4 }
  0x1f   :  { %2076 = vmatmul.mubr.msk.bf16.gmra.mrb[4].mxu0 %vm186_vm1, %v2158_v5  ;;  %v2171_v5 = vld [vmem:[#allocation3] ss:$8 sps:$4 sm:$0xff]  }
  0x20   :  { %2079 = vmatprep.mubr.msk.bf16.mxu0 %vm186_vm1, %v2159_v6  ;;  %v2221_v6 = vld [vmem:[%s2529_s4 + $0x10] sm:$0xff]   ;;  %2106 = vmatpush3.bf16.msra.mxu0 %v2220_v4 }
  0x21   :  { %2107 = vmatprep.subr.bf16.mxu0 %v2221_v6 }
  0x24   :  { %2108 = vmatpush3.bf16.msra.mxu0 %v2221_v6 }
  0x27   :  { %2080 = vmatmul.mubr.msk.bf16.gmra.mrb[8].mxu0 %vm186_vm1, %v2160_v7  ;;  %v2174_v7 = vld [vmem:[#allocation3 + $0x14] ss:$8 sps:$4 sm:$0xff]  }
  0x28   :  { %2083 = vmatprep.mubr.msk.bf16.mxu0 %vm186_vm1, %v2161_v8  ;;  %v2176_v8 = vld [vmem:[#allocation3 + $0x10] ss:$8 sps:$4 sm:$0xff]  }
  0x2f   :  { %2084 = vmatmul.mubr.msk.bf16.gmra.mrb[12].mxu0 %vm186_vm1, %v2162_v9  ;;  %v2177_v9 = vld [vmem:[#allocation3 + $0x24] ss:$8 sps:$4 sm:$0xff]  }
  0x30   :  { %2087 = vmatprep.mubr.msk.bf16.mxu0 %vm186_vm1, %v2163_v10  ;;  %v2179_v10 = vld [vmem:[#allocation3 + $0x20] ss:$8 sps:$4 sm:$0xff]  }
  0x37   :  { %2088 = vmatmul.mubr.msk.bf16.gmra.mrb[16].mxu0 %vm186_vm1, %v2164_v11  ;;  %v2180_v11 = vld [vmem:[#allocation3 + $0x34] ss:$8 sps:$4 sm:$0xff]  }
  0x38   :  { %2091 = vmatprep.mubr.msk.bf16.mxu0 %vm186_vm1, %v2165_v12  ;;  %v2182_v12 = vld [vmem:[#allocation3 + $0x30] ss:$8 sps:$4 sm:$0xff]  }
  0x3f   :  { %2092 = vmatmul.mubr.msk.bf16.gmra.mrb[20].mxu0 %vm186_vm1, %v2166_v13  ;;  %v2183_v13 = vld [vmem:[#allocation3 + $0x44] ss:$8 sps:$4 sm:$0xff]  }
  0x40   :  { %2095 = vmatprep.mubr.msk.bf16.mxu0 %vm186_vm1, %v2167_v14  ;;  %v2185_v14 = vld [vmem:[#allocation3 + $0x40] ss:$8 sps:$4 sm:$0xff]  }
  0x47   :  { %2096 = vmatmul.mubr.msk.bf16.gmra.mrb[24].mxu0 %vm186_vm1, %v2168_v15  ;;  %v2186_v15 = vld [vmem:[#allocation3 + $0x54] ss:$8 sps:$4 sm:$0xff]  }
  0x48   :  { %2099 = vmatprep.mubr.msk.bf16.mxu0 %vm186_vm1, %v2169_v16  ;;  %v2188_v16 = vld [vmem:[#allocation3 + $0x50] ss:$8 sps:$4 sm:$0xff]  }
  0x4f   :  { %2100 = vmatmul.mubr.msk.bf16.gmra.mrb[28].mxu0 %vm186_vm1, %v2170_v17  ;;  %v2189_v17 = vld [vmem:[#allocation3 + $0x64] ss:$8 sps:$4 sm:$0xff]  }
  0xea   :  { %v2073_v19 = vpop.f32.mrb[0].mxu0 }
  0xeb   :  { %v273_v20 = vpop.f32.mrb[1].mxu0 }
  0xec   :  { %v2074_v21 = vpop.f32.mrb[2].mxu0 }
  0xed   :  { %v401_v22 = vpack.c.bf16 %v2074_v21, %v2073_v19  ;;  %v276_v23 = vpop.f32.mrb[3].mxu0  ;;  %v2192_v19 = vld [vmem:[#allocation3 + $0x74] ss:$8 sps:$4 sm:$0xff]   ;;  %v2195_v21 = vld [vmem:[#allocation3 + $0x84] ss:$8 sps:$4 sm:$0xff]  }
  0xee   :  { %v400_v24 = vpack.c.bf16 %v276_v23, %v273_v20  ;;  %v2194_v20 = vld [vmem:[#allocation3 + $0x70] ss:$8 sps:$4 sm:$0xff]   ;;  %v2198_v23 = vld [vmem:[#allocation3 + $0x94] ss:$8 sps:$4 sm:$0xff]  }
  0xf2   :  { %v2077_v25 = vpop.f32.mrb[4].mxu0 }
  0xf3   :  { %v289_v26 = vpop.f32.mrb[5].mxu0 }
  0xf4   :  { %v2078_v27 = vpop.f32.mrb[6].mxu0 }
  0xf5   :  { %v403_v28 = vpack.c.bf16 %v2078_v27, %v2077_v25  ;;  %v292_v29 = vpop.f32.mrb[7].mxu0  ;;  %v2201_v25 = vld [vmem:[#allocation3 + $0xa4] ss:$8 sps:$4 sm:$0xff]   ;;  %v2204_v27 = vld [vmem:[#allocation3 + $0xb4] ss:$8 sps:$4 sm:$0xff]  }
  0xf6   :  { %v402_v30 = vpack.c.bf16 %v292_v29, %v289_v26  ;;  %v2203_v26 = vld [vmem:[#allocation3 + $0xa0] ss:$8 sps:$4 sm:$0xff]   ;;  %v2206_v29 = vld [vmem:[#allocation3 + $0xb0] ss:$8 sps:$4 sm:$0xff]  }
  0xfa   :  { %v2081_v31 = vpop.f32.mrb[8].mxu0 }
  0xfb   :  { %v305_v32 = vpop.f32.mrb[9].mxu0 }
  0xfc   :  { %v2082_v33 = vpop.f32.mrb[10].mxu0 }
  0xfd   :  { %v405_v34 = vpack.c.bf16 %v2082_v33, %v2081_v31  ;;  %v308_v35 = vpop.f32.mrb[11].mxu0  ;;  %v2223_v31 = vld [vmem:[%s2529_s4 + $0x20] sm:$0xff]  }
  0xfe   :  { %v404_v36 = vpack.c.bf16 %v308_v35, %v305_v32  ;;  %v2224_v32 = vld [vmem:[%s2529_s4 + $0x28] sm:$0xff]   ;;  %v2225_v35 = vld [vmem:[%s2529_s4 + $0x30] sm:$0xff]  }
  0xff   :  { %v2209_v33 = vld [vmem:[#allocation3 + $0xc0] ss:$8 sps:$4 sm:$0xff]  }
 0x102   :  { %v2085_v37 = vpop.f32.mrb[12].mxu0 }
 0x103   :  { %v321_v38 = vpop.f32.mrb[13].mxu0 }
 0x104   :  { %v2086_v39 = vpop.f32.mrb[14].mxu0 }
 0x105   :  { %v407_v40 = vpack.c.bf16 %v2086_v39, %v2085_v37  ;;  %v324_v41 = vpop.f32.mrb[15].mxu0  ;;  %v2212_v37 = vld [vmem:[#allocation3 + $0xd0] ss:$8 sps:$4 sm:$0xff]   ;;  %v2215_v39 = vld [vmem:[#allocation3 + $0xe0] ss:$8 sps:$4 sm:$0xff]  }
 0x106   :  { %v406_v42 = vpack.c.bf16 %v324_v41, %v321_v38  ;;  %v2213_v38 = vld [vmem:[#allocation3 + $0xe4] ss:$8 sps:$4 sm:$0xff]   ;;  %v2218_v41 = vld [vmem:[#allocation3 + $0xf0] ss:$8 sps:$4 sm:$0xff]  }
 0x10a   :  { %v2089_v43 = vpop.f32.mrb[16].mxu0 }
 0x10b   :  { %v337_v44 = vpop.f32.mrb[17].mxu0 }
 0x10c   :  { %v2090_v45 = vpop.f32.mrb[18].mxu0 }
 0x10d   :  { %v409_v46 = vpack.c.bf16 %v2090_v45, %v2089_v43  ;;  %v340_v47 = vpop.f32.mrb[19].mxu0 }
 0x10e   :  { %v408_v48 = vpack.c.bf16 %v340_v47, %v337_v44  ;;  %v2395_v44 = vld [vmem:[%s2528_s3] ss:$0 sm:$0xff] }
 0x110   :  { %1933 = vmatprep.subr.bf16.mxu1 %v408_v48 }
 0x111   :  { %1934 = vmatpush3.bf16.msra.mxu1 %v400_v24  ;;  %v2200_v24 = vld [vmem:[#allocation3 + $0x90] ss:$8 sps:$4 sm:$0xff]  }
 0x112   :  { %v2093_v49 = vpop.f32.mrb[20].mxu0  ;;  %1935 = vmatprep.subr.bf16.mxu1 %v409_v46 }
 0x113   :  { %v353_v50 = vpop.f32.mrb[21].mxu0 }
 0x114   :  { %v2094_v51 = vpop.f32.mrb[22].mxu0 }
 0x115   :  { %v411_v52 = vpack.c.bf16 %v2094_v51, %v2093_v49  ;;  %v356_v53 = vpop.f32.mrb[23].mxu0  ;;  %1936 = vmatpush3.bf16.msra.mxu1 %v401_v22  ;;  %v2197_v22 = vld [vmem:[#allocation3 + $0x80] ss:$8 sps:$4 sm:$0xff]  }
 0x116   :  { %v410_v54 = vpack.c.bf16 %v356_v53, %v353_v50 }
 0x118   :  { %1937 = vmatprep.subr.bf16.mxu1 %v410_v54 }
 0x119   :  { %1938 = vmatpush3.bf16.msra.mxu1 %v402_v30  ;;  %v2207_v30 = vld [vmem:[#allocation3 + $0xc4] ss:$8 sps:$4 sm:$0xff]  }
 0x11a   :  { %v2097_v55 = vpop.f32.mrb[24].mxu0  ;;  %1939 = vmatprep.subr.bf16.mxu1 %v411_v52 }
 0x11b   :  { %v369_v56 = vpop.f32.mrb[25].mxu0 }
 0x11c   :  { %v2098_v57 = vpop.f32.mrb[26].mxu0 }
 0x11d   :  { %v413_v58 = vpack.c.bf16 %v2098_v57, %v2097_v55  ;;  %v372_v59 = vpop.f32.mrb[27].mxu0  ;;  %1940 = vmatpush3.bf16.msra.mxu1 %v403_v28  ;;  %v2222_v28 = vld [vmem:[%s2529_s4 + $0x18] sm:$0xff]  }
 0x11e   :  { %v412_v60 = vpack.c.bf16 %v372_v59, %v369_v56  ;;  %2109 = vmatprep.subr.bf16.mxu0 %v2222_v28 }
 0x11f   :  { %2110 = vmatpush3.bf16.msra.mxu0 %v2222_v28 }
 0x120   :  { %1941 = vmatprep.subr.bf16.mxu1 %v412_v60  ;;  %2111 = vmatprep.subr.bf16.mxu0 %v2223_v31 }
 0x121   :  { %1942 = vmatpush3.bf16.msra.mxu1 %v404_v36  ;;  %v2226_v36 = vld [vmem:[%s2529_s4 + $0x38] sm:$0xff]  }
 0x122   :  { %v2101_v61 = vpop.f32.mrb[28].mxu0  ;;  %1943 = vmatprep.subr.bf16.mxu1 %v413_v58 }
 0x123   :  { %v385_v62 = vpop.f32.mrb[29].mxu0  ;;  %2112 = vmatpush3.bf16.msra.mxu0 %v2223_v31 }
 0x124   :  { %v2102_v63 = vpop.f32.mrb[30].mxu0  ;;  %2113 = vmatprep.subr.bf16.mxu0 %v2224_v32 }
 0x125   :  { %v415_v0 = vpack.c.bf16 %v2102_v63, %v2101_v61  ;;  %v388_v1 = vpop.f32.mrb[31].mxu0  ;;  %1944 = vmatpush3.bf16.msra.mxu1 %v405_v34  ;;  %v2210_v34 = vld [vmem:[#allocation3 + $0xd4] ss:$8 sps:$4 sm:$0xff]  }
 0x126   :  { %v414_v2 = vpack.c.bf16 %v388_v1, %v385_v62 }
 0x127   :  { %2114 = vmatpush3.bf16.msra.mxu0 %v2224_v32 }
 0x128   :  { %1945 = vmatprep.subr.bf16.mxu1 %v414_v2  ;;  %2115 = vmatprep.subr.bf16.mxu0 %v2225_v35 }
 0x129   :  { %1946 = vmatpush3.bf16.msra.mxu1 %v406_v42 }
 0x12a   :  { %1947 = vmatprep.subr.bf16.mxu1 %v415_v0 }
 0x12b   :  { %2116 = vmatpush3.bf16.msra.mxu0 %v2225_v35 }
 0x12c   :  { %2117 = vmatprep.subr.bf16.mxu0 %v2226_v36 }
 0x12d   :  { %1948 = vmatpush3.bf16.msra.mxu1 %v407_v40  ;;  %v2216_v40 = vld [vmem:[#allocation3 + $0xf4] ss:$8 sps:$4 sm:$0xff]  }
 0x12f   :  { %2118 = vmatpush3.bf16.msra.mxu0 %v2226_v36 }
 0x130   :  { %673 = vmatmul.mubr.bf16.vlgmr.msra.gmra.mrb[0].mxu1 %v2171_v5 }
 0x131   :  { %680 = vmatprep.mubr.bf16.mxu1 %v2174_v7 }
 0x138   :  { %681 = vmatmul.mubr.bf16.gmra.mrb[4].mxu1 %v2176_v8 }
 0x139   :  { %688 = vmatprep.mubr.bf16.mxu1 %v2177_v9 }
 0x140   :  { %689 = vmatmul.mubr.bf16.gmra.mrb[8].mxu1 %v2179_v10 }
 0x141   :  { %696 = vmatprep.mubr.bf16.mxu1 %v2180_v11 }
 0x148   :  { %697 = vmatmul.mubr.bf16.gmra.mrb[12].mxu1 %v2182_v12 }
 0x149   :  { %704 = vmatprep.mubr.bf16.mxu1 %v2183_v13 }
 0x150   :  { %705 = vmatmul.mubr.bf16.gmra.mrb[16].mxu1 %v2185_v14 }
 0x151   :  { %712 = vmatprep.mubr.bf16.mxu1 %v2186_v15 }
 0x158   :  { %713 = vmatmul.mubr.bf16.gmra.mrb[20].mxu1 %v2188_v16 }
 0x159   :  { %720 = vmatprep.mubr.bf16.mxu1 %v2189_v17 }
 0x160   :  { %721 = vmatmul.mubr.bf16.gmra.mrb[24].mxu1 %v2191_v18 }
 0x161   :  { %728 = vmatprep.mubr.bf16.mxu1 %v2192_v19 }
 0x168   :  { %729 = vmatmul.mubr.bf16.gmra.mrb[28].mxu1 %v2194_v20 }
 0x169   :  { %736 = vmatprep.mubr.bf16.mxu1 %v2195_v21 }
 0x170   :  { %737 = vmatmul.mubr.bf16.gmra.mrb[32].mxu1 %v2197_v22 }
 0x171   :  { %744 = vmatprep.mubr.bf16.mxu1 %v2198_v23 }
 0x178   :  { %745 = vmatmul.mubr.bf16.gmra.mrb[36].mxu1 %v2200_v24 }
 0x179   :  { %752 = vmatprep.mubr.bf16.mxu1 %v2201_v25 }
 0x180   :  { %753 = vmatmul.mubr.bf16.gmra.mrb[40].mxu1 %v2203_v26 }
 0x181   :  { %760 = vmatprep.mubr.bf16.mxu1 %v2204_v27 }
 0x188   :  { %761 = vmatmul.mubr.bf16.gmra.mrb[44].mxu1 %v2206_v29 }
 0x189   :  { %768 = vmatprep.mubr.bf16.mxu1 %v2207_v30 }
 0x190   :  { %769 = vmatmul.mubr.bf16.gmra.mrb[48].mxu1 %v2209_v33 }
 0x191   :  { %776 = vmatprep.mubr.bf16.mxu1 %v2210_v34 }
 0x198   :  { %777 = vmatmul.mubr.bf16.gmra.mrb[52].mxu1 %v2212_v37 }
 0x199   :  { %784 = vmatprep.mubr.bf16.mxu1 %v2213_v38 }
 0x1a0   :  { %785 = vmatmul.mubr.bf16.gmra.mrb[56].mxu1 %v2215_v39 }
 0x1a1   :  { %792 = vmatprep.mubr.bf16.mxu1 %v2216_v40 }
 0x1a8   :  { %793 = vmatmul.mubr.bf16.gmra.mrb[60].mxu1 %v2218_v41 }
 0x203   :  { %v1949_v42 = vpop.f32.mrb[0].mxu1 }
 0x204   :  { %v1950_v43 = vpop.f32.mrb[1].mxu1 }
 0x205   :  { %v1951_v45 = vadd.f32 %v1950_v43, %v1949_v42  ;;  %v1952_v46 = vpop.f32.mrb[2].mxu1 }
 0x206   :  { %v1953_v47 = vpop.f32.mrb[3].mxu1 }
 0x207   :  { %v907_v48 = vadd.f32 %v1951_v45, %v2395_v44  ;;  %v1954_v49 = vadd.f32 %v1953_v47, %v1952_v46 }
 0x209   :  { %v908_v50 = vadd.f32 %v1954_v49, %v2395_v44  ;;  %v939_v51 = vmax.f32 %v907_v48, 0.0 }
 0x20b   :  { %v940_v52 = vmax.f32 %v908_v50, 0.0  ;;  %v1955_v53 = vpop.f32.mrb[4].mxu1 }
 0x20c   :  { %v1956_v54 = vpop.f32.mrb[5].mxu1 }
 0x20d   :  { %v1957_v55 = vadd.f32 %v1956_v54, %v1955_v53  ;;  %v1958_v56 = vpop.f32.mrb[6].mxu1  ;;  %v971_v57 = vpack.c.bf16 %v940_v52, %v939_v51 }
 0x20e   :  { %v1959_v58 = vpop.f32.mrb[7].mxu1 }
 0x20f   :  { %v909_v59 = vadd.f32 %v1957_v55, %v2395_v44  ;;  %v1960_v60 = vadd.f32 %v1959_v58, %v1958_v56  ;;  %1730 = vst [vmem:[%s2530_s5] sm:$0xff] %v971_v57   ;;  %2119 = vmatprep.mubr.bf16.mxu0 %v971_v57 }
 0x211   :  { %v910_v61 = vadd.f32 %v1960_v60, %v2395_v44  ;;  %v941_v62 = vmax.f32 %v909_v59, 0.0 }
 0x213   :  { %v942_v63 = vmax.f32 %v910_v61, 0.0  ;;  %v1961_v0 = vpop.f32.mrb[8].mxu1 }
 0x214   :  { %v1962_v1 = vpop.f32.mrb[9].mxu1 }
 0x215   :  { %v972_v2 = vpack.c.bf16 %v942_v63, %v941_v62  ;;  %v1963_v3 = vadd.f32 %v1962_v1, %v1961_v0  ;;  %v1964_v4 = vpop.f32.mrb[10].mxu1 }
 0x216   :  { %v1965_v5 = vpop.f32.mrb[11].mxu1 }
 0x217   :  { %1886 = vst [vmem:[%s2530_s5 + $0x8] sm:$0xff] %v972_v2   ;;  %v911_v6 = vadd.f32 %v1963_v3, %v2395_v44  ;;  %v1966_v7 = vadd.f32 %v1965_v5, %v1964_v4  ;;  %2120 = vmatmul.mubr.bf16.vlgmr.msra.gmra.mrb[32].mxu0 %v972_v2 }
 0x219   :  { %v912_v8 = vadd.f32 %v1966_v7, %v2395_v44  ;;  %v943_v9 = vmax.f32 %v911_v6, 0.0 }
 0x21b   :  { %v944_v10 = vmax.f32 %v912_v8, 0.0  ;;  %v1967_v11 = vpop.f32.mrb[12].mxu1 }
 0x21c   :  { %v1968_v12 = vpop.f32.mrb[13].mxu1 }
 0x21d   :  { %v1969_v13 = vadd.f32 %v1968_v12, %v1967_v11  ;;  %v1970_v14 = vpop.f32.mrb[14].mxu1  ;;  %v973_v15 = vpack.c.bf16 %v944_v10, %v943_v9 }
 0x21e   :  { %v1971_v16 = vpop.f32.mrb[15].mxu1 }
 0x21f   :  { %v913_v17 = vadd.f32 %v1969_v13, %v2395_v44  ;;  %v1972_v18 = vadd.f32 %v1971_v16, %v1970_v14  ;;  %1887 = vst [vmem:[%s2530_s5 + $0x10] sm:$0xff] %v973_v15   ;;  %2123 = vmatprep.mubr.bf16.mxu0 %v973_v15 }
 0x221   :  { %v914_v19 = vadd.f32 %v1972_v18, %v2395_v44  ;;  %v945_v20 = vmax.f32 %v913_v17, 0.0 }
 0x223   :  { %v946_v21 = vmax.f32 %v914_v19, 0.0  ;;  %v1973_v22 = vpop.f32.mrb[16].mxu1 }
 0x224   :  { %v1974_v23 = vpop.f32.mrb[17].mxu1 }
 0x225   :  { %v1975_v24 = vadd.f32 %v1974_v23, %v1973_v22  ;;  %v1976_v25 = vpop.f32.mrb[18].mxu1  ;;  %v974_v26 = vpack.c.bf16 %v946_v21, %v945_v20 }
 0x226   :  { %v1977_v27 = vpop.f32.mrb[19].mxu1 }
 0x227   :  { %v915_v28 = vadd.f32 %v1975_v24, %v2395_v44  ;;  %v1978_v29 = vadd.f32 %v1977_v27, %v1976_v25  ;;  %1888 = vst [vmem:[%s2530_s5 + $0x18] sm:$0xff] %v974_v26   ;;  %2124 = vmatmul.mubr.bf16.gmra.mrb[36].mxu0 %v974_v26 }
 0x229   :  { %v916_v30 = vadd.f32 %v1978_v29, %v2395_v44  ;;  %v947_v31 = vmax.f32 %v915_v28, 0.0 }
 0x22b   :  { %v948_v32 = vmax.f32 %v916_v30, 0.0  ;;  %v1979_v33 = vpop.f32.mrb[20].mxu1 }
 0x22c   :  { %v1980_v34 = vpop.f32.mrb[21].mxu1 }
 0x22d   :  { %v1981_v35 = vadd.f32 %v1980_v34, %v1979_v33  ;;  %v1982_v36 = vpop.f32.mrb[22].mxu1  ;;  %v975_v37 = vpack.c.bf16 %v948_v32, %v947_v31 }
 0x22e   :  { %v1983_v38 = vpop.f32.mrb[23].mxu1 }
 0x22f   :  { %v917_v39 = vadd.f32 %v1981_v35, %v2395_v44  ;;  %v1984_v40 = vadd.f32 %v1983_v38, %v1982_v36  ;;  %1889 = vst [vmem:[%s2530_s5 + $0x20] sm:$0xff] %v975_v37   ;;  %2127 = vmatprep.mubr.bf16.mxu0 %v975_v37 }
 0x231   :  { %v918_v41 = vadd.f32 %v1984_v40, %v2395_v44  ;;  %v949_v42 = vmax.f32 %v917_v39, 0.0 }
 0x233   :  { %v950_v43 = vmax.f32 %v918_v41, 0.0  ;;  %v1985_v45 = vpop.f32.mrb[24].mxu1 }
 0x234   :  { %v1986_v46 = vpop.f32.mrb[25].mxu1 }
 0x235   :  { %v1987_v47 = vadd.f32 %v1986_v46, %v1985_v45  ;;  %v1988_v48 = vpop.f32.mrb[26].mxu1  ;;  %v976_v49 = vpack.c.bf16 %v950_v43, %v949_v42 }
 0x236   :  { %v1989_v50 = vpop.f32.mrb[27].mxu1 }
 0x237   :  { %v919_v51 = vadd.f32 %v1987_v47, %v2395_v44  ;;  %v1990_v52 = vadd.f32 %v1989_v50, %v1988_v48  ;;  %1890 = vst [vmem:[%s2530_s5 + $0x28] sm:$0xff] %v976_v49   ;;  %2128 = vmatmul.mubr.bf16.gmra.mrb[40].mxu0 %v976_v49 }
 0x239   :  { %v920_v53 = vadd.f32 %v1990_v52, %v2395_v44  ;;  %v951_v54 = vmax.f32 %v919_v51, 0.0 }
 0x23b   :  { %v952_v55 = vmax.f32 %v920_v53, 0.0  ;;  %v1991_v56 = vpop.f32.mrb[28].mxu1 }
 0x23c   :  { %v1992_v57 = vpop.f32.mrb[29].mxu1 }
 0x23d   :  { %v1993_v58 = vadd.f32 %v1992_v57, %v1991_v56  ;;  %v1994_v59 = vpop.f32.mrb[30].mxu1  ;;  %v977_v60 = vpack.c.bf16 %v952_v55, %v951_v54 }
 0x23e   :  { %v1995_v61 = vpop.f32.mrb[31].mxu1 }
 0x23f   :  { %v921_v62 = vadd.f32 %v1993_v58, %v2395_v44  ;;  %v1996_v63 = vadd.f32 %v1995_v61, %v1994_v59  ;;  %1891 = vst [vmem:[%s2530_s5 + $0x30] sm:$0xff] %v977_v60   ;;  %2131 = vmatprep.mubr.bf16.mxu0 %v977_v60 }
 0x241   :  { %v922_v0 = vadd.f32 %v1996_v63, %v2395_v44  ;;  %v953_v1 = vmax.f32 %v921_v62, 0.0 }
 0x243   :  { %v954_v2 = vmax.f32 %v922_v0, 0.0  ;;  %v1997_v3 = vpop.f32.mrb[32].mxu1 }
 0x244   :  { %v1998_v4 = vpop.f32.mrb[33].mxu1 }
 0x245   :  { %v1999_v5 = vadd.f32 %v1998_v4, %v1997_v3  ;;  %v2000_v6 = vpop.f32.mrb[34].mxu1  ;;  %v978_v7 = vpack.c.bf16 %v954_v2, %v953_v1 }
 0x246   :  { %v2001_v8 = vpop.f32.mrb[35].mxu1 }
 0x247   :  { %v923_v9 = vadd.f32 %v1999_v5, %v2395_v44  ;;  %v2002_v10 = vadd.f32 %v2001_v8, %v2000_v6  ;;  %1892 = vst [vmem:[%s2530_s5 + $0x38] sm:$0xff] %v978_v7   ;;  %2132 = vmatmul.mubr.bf16.gmra.mrb[44].mxu0 %v978_v7 }
 0x249   :  { %v924_v11 = vadd.f32 %v2002_v10, %v2395_v44  ;;  %v955_v12 = vmax.f32 %v923_v9, 0.0 }
 0x24b   :  { %v956_v13 = vmax.f32 %v924_v11, 0.0  ;;  %v2003_v14 = vpop.f32.mrb[36].mxu1 }
 0x24c   :  { %v2004_v15 = vpop.f32.mrb[37].mxu1 }
 0x24d   :  { %v2005_v16 = vadd.f32 %v2004_v15, %v2003_v14  ;;  %v2006_v17 = vpop.f32.mrb[38].mxu1  ;;  %v979_v18 = vpack.c.bf16 %v956_v13, %v955_v12 }
 0x24e   :  { %v2007_v19 = vpop.f32.mrb[39].mxu1 }
 0x24f   :  { %v925_v20 = vadd.f32 %v2005_v16, %v2395_v44  ;;  %v2008_v21 = vadd.f32 %v2007_v19, %v2006_v17  ;;  %1893 = vst [vmem:[%s2530_s5 + $0x40] sm:$0xff] %v979_v18   ;;  %2135 = vmatprep.mubr.bf16.mxu0 %v979_v18 }
 0x251   :  { %v926_v22 = vadd.f32 %v2008_v21, %v2395_v44  ;;  %v957_v23 = vmax.f32 %v925_v20, 0.0 }
 0x253   :  { %v958_v24 = vmax.f32 %v926_v22, 0.0  ;;  %v2009_v25 = vpop.f32.mrb[40].mxu1 }
 0x254   :  { %v2010_v26 = vpop.f32.mrb[41].mxu1 }
 0x255   :  { %v2011_v27 = vadd.f32 %v2010_v26, %v2009_v25  ;;  %v2012_v28 = vpop.f32.mrb[42].mxu1  ;;  %v980_v29 = vpack.c.bf16 %v958_v24, %v957_v23 }
 0x256   :  { %v2013_v30 = vpop.f32.mrb[43].mxu1 }
 0x257   :  { %v927_v31 = vadd.f32 %v2011_v27, %v2395_v44  ;;  %v2014_v32 = vadd.f32 %v2013_v30, %v2012_v28  ;;  %1894 = vst [vmem:[%s2530_s5 + $0x48] sm:$0xff] %v980_v29   ;;  %2136 = vmatmul.mubr.bf16.gmra.mrb[48].mxu0 %v980_v29 }
 0x259   :  { %v928_v33 = vadd.f32 %v2014_v32, %v2395_v44  ;;  %v959_v34 = vmax.f32 %v927_v31, 0.0 }
 0x25b   :  { %v960_v35 = vmax.f32 %v928_v33, 0.0  ;;  %v2015_v36 = vpop.f32.mrb[44].mxu1 }
 0x25c   :  { %v2016_v37 = vpop.f32.mrb[45].mxu1 }
 0x25d   :  { %v2017_v38 = vadd.f32 %v2016_v37, %v2015_v36  ;;  %v2018_v39 = vpop.f32.mrb[46].mxu1  ;;  %v981_v40 = vpack.c.bf16 %v960_v35, %v959_v34 }
 0x25e   :  { %v2019_v41 = vpop.f32.mrb[47].mxu1 }
 0x25f   :  { %v929_v42 = vadd.f32 %v2017_v38, %v2395_v44  ;;  %v2020_v43 = vadd.f32 %v2019_v41, %v2018_v39  ;;  %1895 = vst [vmem:[%s2530_s5 + $0x50] sm:$0xff] %v981_v40   ;;  %2139 = vmatprep.mubr.bf16.mxu0 %v981_v40 }
 0x261   :  { %v930_v45 = vadd.f32 %v2020_v43, %v2395_v44  ;;  %v961_v46 = vmax.f32 %v929_v42, 0.0 }
 0x263   :  { %v962_v47 = vmax.f32 %v930_v45, 0.0  ;;  %v2021_v48 = vpop.f32.mrb[48].mxu1 }
 0x264   :  { %v2022_v49 = vpop.f32.mrb[49].mxu1 }
 0x265   :  { %v2023_v50 = vadd.f32 %v2022_v49, %v2021_v48  ;;  %v2024_v51 = vpop.f32.mrb[50].mxu1  ;;  %v982_v52 = vpack.c.bf16 %v962_v47, %v961_v46 }
 0x266   :  { %v2025_v53 = vpop.f32.mrb[51].mxu1 }
 0x267   :  { %v931_v54 = vadd.f32 %v2023_v50, %v2395_v44  ;;  %v2026_v55 = vadd.f32 %v2025_v53, %v2024_v51  ;;  %1896 = vst [vmem:[%s2530_s5 + $0x58] sm:$0xff] %v982_v52   ;;  %2140 = vmatmul.mubr.bf16.gmra.mrb[52].mxu0 %v982_v52 }
 0x269   :  { %v932_v56 = vadd.f32 %v2026_v55, %v2395_v44  ;;  %v963_v57 = vmax.f32 %v931_v54, 0.0 }
 0x26b   :  { %v964_v58 = vmax.f32 %v932_v56, 0.0  ;;  %v2027_v59 = vpop.f32.mrb[52].mxu1 }
 0x26c   :  { %v2028_v60 = vpop.f32.mrb[53].mxu1 }
 0x26d   :  { %v2029_v61 = vadd.f32 %v2028_v60, %v2027_v59  ;;  %v2030_v62 = vpop.f32.mrb[54].mxu1  ;;  %v983_v63 = vpack.c.bf16 %v964_v58, %v963_v57 }
 0x26e   :  { %v2031_v0 = vpop.f32.mrb[55].mxu1 }
 0x26f   :  { %v933_v1 = vadd.f32 %v2029_v61, %v2395_v44  ;;  %v2032_v2 = vadd.f32 %v2031_v0, %v2030_v62  ;;  %1897 = vst [vmem:[%s2530_s5 + $0x60] sm:$0xff] %v983_v63   ;;  %2143 = vmatprep.mubr.bf16.mxu0 %v983_v63 }
 0x271   :  { %v934_v3 = vadd.f32 %v2032_v2, %v2395_v44  ;;  %v965_v4 = vmax.f32 %v933_v1, 0.0 }
 0x273   :  { %v966_v5 = vmax.f32 %v934_v3, 0.0  ;;  %v2033_v6 = vpop.f32.mrb[56].mxu1 }
 0x274   :  { %v2034_v7 = vpop.f32.mrb[57].mxu1 }
 0x275   :  { %v2035_v8 = vadd.f32 %v2034_v7, %v2033_v6  ;;  %v2036_v9 = vpop.f32.mrb[58].mxu1  ;;  %v984_v10 = vpack.c.bf16 %v966_v5, %v965_v4 }
 0x276   :  { %v2037_v11 = vpop.f32.mrb[59].mxu1 }
 0x277   :  { %v935_v12 = vadd.f32 %v2035_v8, %v2395_v44  ;;  %v2038_v13 = vadd.f32 %v2037_v11, %v2036_v9  ;;  %1898 = vst [vmem:[%s2530_s5 + $0x68] sm:$0xff] %v984_v10   ;;  %2144 = vmatmul.mubr.bf16.gmra.mrb[56].mxu0 %v984_v10 }
 0x279   :  { %v936_v14 = vadd.f32 %v2038_v13, %v2395_v44  ;;  %v967_v15 = vmax.f32 %v935_v12, 0.0 }
 0x27b   :  { %v968_v16 = vmax.f32 %v936_v14, 0.0  ;;  %v2039_v17 = vpop.f32.mrb[60].mxu1 }
 0x27c   :  { %v2040_v18 = vpop.f32.mrb[61].mxu1 }
 0x27d   :  { %v2041_v19 = vadd.f32 %v2040_v18, %v2039_v17  ;;  %v2042_v20 = vpop.f32.mrb[62].mxu1  ;;  %v985_v21 = vpack.c.bf16 %v968_v16, %v967_v15 }
 0x27e   :  { %v2043_v22 = vpop.f32.mrb[63].mxu1 }
 0x27f   :  { %v937_v23 = vadd.f32 %v2041_v19, %v2395_v44  ;;  %v2044_v24 = vadd.f32 %v2043_v22, %v2042_v20  ;;  %1899 = vst [vmem:[%s2530_s5 + $0x70] sm:$0xff] %v985_v21   ;;  %2147 = vmatprep.mubr.bf16.mxu0 %v985_v21 }
 0x281   :  { %v938_v25 = vadd.f32 %v2044_v24, %v2395_v44  ;;  %v969_v26 = vmax.f32 %v937_v23, 0.0 }
 0x283   :  { %v970_v27 = vmax.f32 %v938_v25, 0.0 }
 0x285   :  { %v986_v28 = vpack.c.bf16 %v970_v27, %v969_v26 }
 0x287   :  { %1900 = vst [vmem:[%s2530_s5 + $0x78] sm:$0xff] %v986_v28   ;;  %2148 = vmatmul.mubr.bf16.gmra.mrb[60].mxu0 %v986_v28 }
 0x2ea   :  { %v2121_v29 = vpop.f32.mrb[32].mxu0 }
 0x2eb   :  { %v1229_v30 = vpop.f32.mrb[33].mxu0 }
 0x2ec   :  { %v2122_v31 = vpop.f32.mrb[34].mxu0 }
 0x2ed   :  { %v1814_v32 = vpack.c.bf16 %v2122_v31, %v2121_v29  ;;  %v1232_v33 = vpop.f32.mrb[35].mxu0 }
 0x2ee   :  { %v1809_v34 = vpack.c.bf16 %v1232_v33, %v1229_v30 }
 0x2ef   :  { %1901 = vst [vmem:[%s2531_s6 + $0x8] sm:$0xff] %v1814_v32  }
 0x2f0   :  { %1810 = vst [vmem:[%s2531_s6] sm:$0xff] %v1809_v34  }
 0x2fa   :  { %v2125_v44 = vpop.f32.mrb[36].mxu0 }
 0x2fb   :  { %v1245_v35 = vpop.f32.mrb[37].mxu0 }
 0x2fc   :  { %v2126_v36 = vpop.f32.mrb[38].mxu0 }
 0x2fd   :  { %v1824_v37 = vpack.c.bf16 %v2126_v36, %v2125_v44  ;;  %v1248_v38 = vpop.f32.mrb[39].mxu0 }
 0x2fe   :  { %v1819_v39 = vpack.c.bf16 %v1248_v38, %v1245_v35 }
 0x2ff   :  { %1903 = vst [vmem:[%s2531_s6 + $0x18] sm:$0xff] %v1824_v37  }
 0x300   :  { %1902 = vst [vmem:[%s2531_s6 + $0x10] sm:$0xff] %v1819_v39  }
 0x30a   :  { %v2129_v40 = vpop.f32.mrb[40].mxu0 }
 0x30b   :  { %v1261_v41 = vpop.f32.mrb[41].mxu0 }
 0x30c   :  { %v2130_v42 = vpop.f32.mrb[42].mxu0 }
 0x30d   :  { %v1834_v43 = vpack.c.bf16 %v2130_v42, %v2129_v40  ;;  %v1264_v45 = vpop.f32.mrb[43].mxu0 }
 0x30e   :  { %v1829_v46 = vpack.c.bf16 %v1264_v45, %v1261_v41 }
 0x30f   :  { %1905 = vst [vmem:[%s2531_s6 + $0x28] sm:$0xff] %v1834_v43  }
 0x310   :  { %1904 = vst [vmem:[%s2531_s6 + $0x20] sm:$0xff] %v1829_v46  }
 0x31a   :  { %v2133_v47 = vpop.f32.mrb[44].mxu0 }
 0x31b   :  { %v1277_v48 = vpop.f32.mrb[45].mxu0 }
 0x31c   :  { %v2134_v49 = vpop.f32.mrb[46].mxu0 }
 0x31d   :  { %v1844_v50 = vpack.c.bf16 %v2134_v49, %v2133_v47  ;;  %v1280_v51 = vpop.f32.mrb[47].mxu0 }
 0x31e   :  { %v1839_v52 = vpack.c.bf16 %v1280_v51, %v1277_v48 }
 0x31f   :  { %1907 = vst [vmem:[%s2531_s6 + $0x38] sm:$0xff] %v1844_v50  }
 0x320   :  { %1906 = vst [vmem:[%s2531_s6 + $0x30] sm:$0xff] %v1839_v52  }
 0x32a   :  { %v2137_v53 = vpop.f32.mrb[48].mxu0 }
 0x32b   :  { %v1293_v54 = vpop.f32.mrb[49].mxu0 }
 0x32c   :  { %v2138_v55 = vpop.f32.mrb[50].mxu0 }
 0x32d   :  { %v1854_v56 = vpack.c.bf16 %v2138_v55, %v2137_v53  ;;  %v1296_v57 = vpop.f32.mrb[51].mxu0 }
 0x32e   :  { %v1849_v58 = vpack.c.bf16 %v1296_v57, %v1293_v54 }
 0x32f   :  { %1909 = vst [vmem:[%s2531_s6 + $0x48] sm:$0xff] %v1854_v56  }
 0x330   :  { %1908 = vst [vmem:[%s2531_s6 + $0x40] sm:$0xff] %v1849_v58  }
 0x33a   :  { %v2141_v59 = vpop.f32.mrb[52].mxu0 }
 0x33b   :  { %v1309_v60 = vpop.f32.mrb[53].mxu0 }
 0x33c   :  { %v2142_v61 = vpop.f32.mrb[54].mxu0 }
 0x33d   :  { %v1864_v62 = vpack.c.bf16 %v2142_v61, %v2141_v59  ;;  %v1312_v63 = vpop.f32.mrb[55].mxu0 }
 0x33e   :  { %v1859_v0 = vpack.c.bf16 %v1312_v63, %v1309_v60 }
 0x33f   :  { %1911 = vst [vmem:[%s2531_s6 + $0x58] sm:$0xff] %v1864_v62  }
 0x340   :  { %1910 = vst [vmem:[%s2531_s6 + $0x50] sm:$0xff] %v1859_v0  }
 0x34a   :  { %v2145_v1 = vpop.f32.mrb[56].mxu0 }
 0x34b   :  { %v1325_v2 = vpop.f32.mrb[57].mxu0 }
 0x34c   :  { %v2146_v3 = vpop.f32.mrb[58].mxu0 }
 0x34d   :  { %v1874_v4 = vpack.c.bf16 %v2146_v3, %v2145_v1  ;;  %v1328_v5 = vpop.f32.mrb[59].mxu0 }
 0x34e   :  { %v1869_v6 = vpack.c.bf16 %v1328_v5, %v1325_v2 }
 0x34f   :  { %1913 = vst [vmem:[%s2531_s6 + $0x68] sm:$0xff] %v1874_v4  }
 0x350   :  { %1912 = vst [vmem:[%s2531_s6 + $0x60] sm:$0xff] %v1869_v6  }
 0x35a   :  { %v2149_v7 = vpop.f32.mrb[60].mxu0 }
 0x35b   :  { %v1341_v8 = vpop.f32.mrb[61].mxu0 }
 0x35c   :  { %v2150_v9 = vpop.f32.mrb[62].mxu0 }
 0x35d   :  { %v1884_v10 = vpack.c.bf16 %v2150_v9, %v2149_v7  ;;  %v1344_v11 = vpop.f32.mrb[63].mxu0 }
 0x35e   :  { %v1879_v12 = vpack.c.bf16 %v1344_v11, %v1341_v8 }
 0x35f   :  { %1915 = vst [vmem:[%s2531_s6 + $0x78] sm:$0xff] %v1884_v10  }
 0x360   :  { %1914 = vst [vmem:[%s2531_s6 + $0x70] sm:$0xff] %v1879_v12  }
 0x361   :  { %1524 = vsyncpa [#allocation4], 1 }

</bundles_post_ra>
